<compile_context>
chip_gen: v5e
topology: v5e:2x2
jax: 0.10.0
libtpu: 0.0.40
codegen_flags: <defaults>
</compile_context>

<pallas_src>
import math

import jax
import jax.numpy as jnp
from jax.experimental import pallas as pl
from jax.experimental.pallas import tpu as pltpu

# ---------------- model config (small synthetic shapes) ----------------
VOCAB = 64
B = 2            # batch
S = 8            # sequence length
H = 32           # hidden size (stands in for 1536 of deberta-v2-xlarge)
NH = 2           # attention heads
DH = H // NH     # head dim
FFN = 64         # intermediate size
C = 5            # number_of_labels
CPAD = 128       # lane-dense padded classifier width
NUM_LAYERS = 2
LN_EPS = 1e-7
NEG_INF = -1e30


def _layernorm(x, g, b):
    mu = jnp.mean(x, axis=-1, keepdims=True)
    xc = x - mu
    var = jnp.mean(xc * xc, axis=-1, keepdims=True)
    return xc * jax.lax.rsqrt(var + LN_EPS) * g + b


# ---------------- fused encoder kernel (one grid step = one layer) ----------------
def _encoder_kernel(
    emb_ref, maskbias_ref, onehot_ref, active_ref,
    emb_g_ref, emb_b_ref,
    wqkv_ref, bqkv_ref, wo_ref, bo_ref,
    ln1_g_ref, ln1_b_ref,
    w1_ref, b1_ref, w2_ref, b2_ref,
    ln2_g_ref, ln2_b_ref,
    cls_w_ref, cls_b_ref,
    logits_ref, loss_ref,
    x_sc,
):
    layer = pl.program_id(0)
    scale = 1.0 / math.sqrt(DH)

    # embedding LayerNorm seeds the residual-stream carry at the first layer
    @pl.when(layer == 0)
    def _():
        x_sc[...] = _layernorm(emb_ref[...], emb_g_ref[...], emb_b_ref[...])

    x = x_sc[...]                       # (B*S, H) f32 residual stream
    maskbias = maskbias_ref[...]        # (B, S) f32 additive key bias

    # ---- attention: fused QKV projection (one MXU pass, N = 3H) ----
    qkv = (jnp.dot(x.astype(jnp.bfloat16), wqkv_ref[...],
                   preferred_element_type=jnp.float32)
           + bqkv_ref[...])                                          # (B*S, 3H) f32
    qkv_b16 = qkv.astype(jnp.bfloat16)

    # per-(b,h) QK^T scores, packed into one (B*NH*S, S) block
    score_blocks = []
    for b in range(B):
        bias_b = maskbias[b:b + 1, :]            # (1, S), broadcast over query rows
        for h in range(NH):
            r0, c0 = b * S, h * DH
            q_bh = qkv_b16[r0:r0 + S, c0:c0 + DH]
            k_bh = qkv_b16[r0:r0 + S, H + c0:H + c0 + DH]
            s = jax.lax.dot_general(
                q_bh, k_bh, (((1,), (1,)), ((), ())),
                preferred_element_type=jnp.float32)                  # (S, S)
            score_blocks.append(s * scale + bias_b)
    s_all = jnp.concatenate(score_blocks, axis=0)                    # (B*NH*S, S)

    # one packed softmax over all (b, h) blocks (f32)
    m = jnp.max(s_all, axis=-1, keepdims=True)
    p = jnp.exp(s_all - m)
    p = p * pl.reciprocal(jnp.sum(p, axis=-1, keepdims=True), approx=True)
    p = p.astype(jnp.bfloat16)

    # per-(b,h) PV, packed back to (B*S, H); one (B*S,H)@(H,H) output projection
    blk = 0
    batch_rows = []
    for b in range(B):
        head_cols = []
        for h in range(NH):
            r0, c0 = b * S, h * DH
            p_bh = p[blk * S:(blk + 1) * S, :]
            v_bh = qkv_b16[r0:r0 + S, 2 * H + c0:2 * H + c0 + DH]
            head_cols.append(jnp.dot(p_bh, v_bh,
                                     preferred_element_type=jnp.float32))
            blk += 1
        batch_rows.append(jnp.concatenate(head_cols, axis=1))        # (S, H)
    o_all = jnp.concatenate(batch_rows, axis=0)                      # (B*S, H)

    attn = (jnp.dot(o_all.astype(jnp.bfloat16), wo_ref[...],
                    preferred_element_type=jnp.float32) + bo_ref[...])
    x = _layernorm(x + attn, ln1_g_ref[...], ln1_b_ref[...])

    # ---- feed-forward ----
    h1 = (jnp.dot(x.astype(jnp.bfloat16), w1_ref[...],
                  preferred_element_type=jnp.float32) + b1_ref[...])
    # TODO(synk): PyTorch/HF DeBERTa uses exact (erf) GELU; tanh approx here.
    h1 = jax.nn.gelu(h1, approximate=True)
    ffn = (jnp.dot(h1.astype(jnp.bfloat16), w2_ref[...],
                   preferred_element_type=jnp.float32) + b2_ref[...])
    x = _layernorm(x + ffn, ln2_g_ref[...], ln2_b_ref[...])
    x_sc[...] = x                                                    # carry to next layer

    # ---- classifier + masked cross-entropy, only at the last layer ----
    @pl.when(layer == NUM_LAYERS - 1)
    def _():
        # dropout(p=0.1) is identity at eval; logits lane-padded to CPAD
        logits_pad = (jnp.dot(x.astype(jnp.bfloat16), cls_w_ref[...],
                              preferred_element_type=jnp.float32)
                      + cls_b_ref[...])                              # (B*S, CPAD)
        logits_ref[...] = logits_pad

        class_mask = jax.lax.broadcasted_iota(jnp.int32, (1, CPAD), 1) < C
        masked_logits = jnp.where(class_mask, logits_pad, NEG_INF)
        mm = jnp.max(masked_logits, axis=-1, keepdims=True)
        lse = mm + jnp.log(jnp.sum(jnp.exp(masked_logits - mm),
                                   axis=-1, keepdims=True))
        picked = jnp.sum(onehot_ref[...] * logits_pad, axis=-1, keepdims=True)
        nll = lse - picked                                           # (B*S, 1)
        act = active_ref[...]                                        # (B*S, 1)
        loss_sum = jnp.sum(nll * act, axis=(0, 1), keepdims=True)    # (1, 1)
        count = jnp.sum(act, axis=(0, 1), keepdims=True)
        loss_ref[...] = loss_sum / jnp.maximum(count, 1.0)


def fused_forward(emb, maskbias, onehot_pad, active, params):
    const2 = lambda l: (0, 0)
    lay3 = lambda l: (l, 0, 0)

    in_specs = [
        pl.BlockSpec((B * S, H), const2),          # emb
        pl.BlockSpec((B, S), const2),              # maskbias
        pl.BlockSpec((B * S, CPAD), const2),       # onehot
        pl.BlockSpec((B * S, 1), const2),          # active
        pl.BlockSpec((1, H), const2),              # emb_ln_g
        pl.BlockSpec((1, H), const2),              # emb_ln_b
        pl.BlockSpec((None, H, 3 * H), lay3),      # wqkv  (per-layer, prefetched)
        pl.BlockSpec((None, 1, 3 * H), lay3),      # bqkv
        pl.BlockSpec((None, H, H), lay3),          # wo
        pl.BlockSpec((None, 1, H), lay3),          # bo
        pl.BlockSpec((None, 1, H), lay3),          # ln1_g
        pl.BlockSpec((None, 1, H), lay3),          # ln1_b
        pl.BlockSpec((None, H, FFN), lay3),        # w_ffn1
        pl.BlockSpec((None, 1, FFN), lay3),        # b_ffn1
        pl.BlockSpec((None, FFN, H), lay3),        # w_ffn2
        pl.BlockSpec((None, 1, H), lay3),          # b_ffn2
        pl.BlockSpec((None, 1, H), lay3),          # ln2_g
        pl.BlockSpec((None, 1, H), lay3),          # ln2_b
        pl.BlockSpec((H, CPAD), const2),           # cls_w_pad (bf16)
        pl.BlockSpec((1, CPAD), const2),           # cls_b_pad
    ]
    out_specs = [
        pl.BlockSpec((B * S, CPAD), const2),       # logits (written at last layer)
        pl.BlockSpec((1, 1), const2),              # loss
    ]

    return pl.pallas_call(
        _encoder_kernel,
        out_shape=(jax.ShapeDtypeStruct((B * S, CPAD), jnp.float32),
                   jax.ShapeDtypeStruct((1, 1), jnp.float32)),
        grid_spec=pltpu.PrefetchScalarGridSpec(
            num_scalar_prefetch=0,
            grid=(NUM_LAYERS,),
            in_specs=in_specs,
            out_specs=out_specs,
            scratch_shapes=[pltpu.VMEM((B * S, H), jnp.float32)]),   # residual carry
        compiler_params=pltpu.CompilerParams(
            dimension_semantics=("arbitrary",)),
    )(emb, maskbias, onehot_pad, active,
      params["emb_ln_g"], params["emb_ln_b"],
      params["wqkv"], params["bqkv"], params["wo"], params["bo"],
      params["ln1_g"], params["ln1_b"],
      params["w_ffn1"], params["b_ffn1"], params["w_ffn2"], params["b_ffn2"],
      params["ln2_g"], params["ln2_b"],
      params["cls_w_pad"], params["cls_b_pad"])


# ---------------- parameter init (deterministic, synthetic) ----------------
def init_params(key):
    def nrm(k, shape, dtype=jnp.bfloat16, scale=0.02):
        return (scale * jax.random.normal(k, shape, dtype=jnp.float32)).astype(dtype)

    ks = jax.random.split(key, 7)
    params = {
        "word_emb": nrm(ks[0], (VOCAB, H), dtype=jnp.float32),
        "emb_ln_g": jnp.ones((1, H), jnp.float32),
        "emb_ln_b": jnp.zeros((1, H), jnp.float32),
        # stacked per-layer weights; matmul operands stored in bf16 (MXU-native),
        # biases / LN params in f32 (elementwise path stays f32 for v5e)
        "wqkv": nrm(ks[1], (NUM_LAYERS, H, 3 * H)),
        "bqkv": jnp.zeros((NUM_LAYERS, 1, 3 * H), jnp.float32),
        "wo": nrm(ks[2], (NUM_LAYERS, H, H)),
        "bo": jnp.zeros((NUM_LAYERS, 1, H), jnp.float32),
        "ln1_g": jnp.ones((NUM_LAYERS, 1, H), jnp.float32),
        "ln1_b": jnp.zeros((NUM_LAYERS, 1, H), jnp.float32),
        "w_ffn1": nrm(ks[3], (NUM_LAYERS, H, FFN)),
        "b_ffn1": jnp.zeros((NUM_LAYERS, 1, FFN), jnp.float32),
        "w_ffn2": nrm(ks[4], (NUM_LAYERS, FFN, H)),
        "b_ffn2": jnp.zeros((NUM_LAYERS, 1, H), jnp.float32),
        "ln2_g": jnp.ones((NUM_LAYERS, 1, H), jnp.float32),
        "ln2_b": jnp.zeros((NUM_LAYERS, 1, H), jnp.float32),
    }
    cls_w = nrm(ks[5], (H, C), dtype=jnp.float32)
    cls_b = jnp.zeros((1, C), jnp.float32)
    params["cls_w_pad"] = (jnp.zeros((H, CPAD), jnp.float32)
                           .at[:, :C].set(cls_w).astype(jnp.bfloat16))
    params["cls_b_pad"] = jnp.zeros((1, CPAD), jnp.float32).at[:, :C].set(cls_b)
    return params


# ---------------- forward (only the embedding gather is XLA glue) ----------------
@jax.jit
def custom_bert_forward(params, ids, mask, labels):
    # embedding lookup (data-dependent gather) stays in XLA
    emb = jnp.take(params["word_emb"], ids.reshape(-1), axis=0)      # (B*S, H) f32

    # compact per-batch additive key bias; broadcast happens inside the kernel
    mask_f = mask.astype(jnp.float32)
    maskbias = (1.0 - mask_f) * -1e9                                 # (B, S)

    onehot_pad = jax.nn.one_hot(labels.reshape(-1), CPAD, dtype=jnp.float32)
    active = (mask.reshape(-1, 1) == 1).astype(jnp.float32)          # (B*S, 1)

    logits_pad, loss11 = fused_forward(emb, maskbias, onehot_pad, active, params)
    logits = logits_pad[:, :C].reshape(B, S, C)
    return {"logits": logits, "loss": loss11[0, 0]}


if __name__ == "__main__":
    key = jax.random.PRNGKey(0)
    k_param, k_ids, k_lab, k_msk = jax.random.split(key, 4)

    params = init_params(k_param)
    ids = jax.random.randint(k_ids, (B, S), 0, VOCAB, dtype=jnp.int32)
    labels = jax.random.randint(k_lab, (B, S), 0, C, dtype=jnp.int32)
    # attention/padding mask: last 2 tokens of each sequence masked out
    mask = jnp.concatenate(
        [jnp.ones((B, S - 2), jnp.int32), jnp.zeros((B, 2), jnp.int32)], axis=1)

    out = custom_bert_forward(params, ids, mask, labels)
    jax.block_until_ready(out["logits"])
    jax.block_until_ready(out["loss"])

    assert out["logits"].shape == (B, S, C)
    assert out["loss"].shape == ()
    assert bool(jnp.isfinite(out["loss"]))
    print("KERNEL_OK")
</pallas_src>

<mosaic_0001>
module attributes {stable_mosaic.version = 11 : i64} {
  func.func @_encoder_kernel(%arg0: i32, %arg1: memref<16x32xf32, #tpu.memory_space<vmem>>, %arg2: memref<2x8xf32, #tpu.memory_space<vmem>>, %arg3: memref<16x128xf32, #tpu.memory_space<vmem>>, %arg4: memref<16x1xf32, #tpu.memory_space<vmem>>, %arg5: memref<1x32xf32, #tpu.memory_space<vmem>>, %arg6: memref<1x32xf32, #tpu.memory_space<vmem>>, %arg7: memref<1x32x96xbf16, #tpu.memory_space<vmem>>, %arg8: memref<1x1x96xf32, #tpu.memory_space<vmem>>, %arg9: memref<1x32x32xbf16, #tpu.memory_space<vmem>>, %arg10: memref<1x1x32xf32, #tpu.memory_space<vmem>>, %arg11: memref<1x1x32xf32, #tpu.memory_space<vmem>>, %arg12: memref<1x1x32xf32, #tpu.memory_space<vmem>>, %arg13: memref<1x32x64xbf16, #tpu.memory_space<vmem>>, %arg14: memref<1x1x64xf32, #tpu.memory_space<vmem>>, %arg15: memref<1x64x32xbf16, #tpu.memory_space<vmem>>, %arg16: memref<1x1x32xf32, #tpu.memory_space<vmem>>, %arg17: memref<1x1x32xf32, #tpu.memory_space<vmem>>, %arg18: memref<1x1x32xf32, #tpu.memory_space<vmem>>, %arg19: memref<32x128xbf16, #tpu.memory_space<vmem>>, %arg20: memref<1x128xf32, #tpu.memory_space<vmem>>, %arg21: memref<16x128xf32, #tpu.memory_space<vmem>>, %arg22: memref<1x1xf32, #tpu.memory_space<vmem>>, %arg23: memref<16x32xf32, #tpu.memory_space<vmem>>) attributes {dimension_semantics = [#tpu.dimension_semantics<arbitrary>], iteration_bounds = array<i64: 2>, scalar_prefetch = 0 : i64, scratch_operands = 1 : i64, tpu.core_type = #tpu.core_type<tc>, window_params = [{pipeline_mode = #tpu.pipeline_mode<synchronous>, transform_indices = @transform_0, window_bounds = array<i64: 16, 32>}, {pipeline_mode = #tpu.pipeline_mode<synchronous>, transform_indices = @transform_1, window_bounds = array<i64: 2, 8>}, {pipeline_mode = #tpu.pipeline_mode<synchronous>, transform_indices = @transform_2, window_bounds = array<i64: 16, 128>}, {pipeline_mode = #tpu.pipeline_mode<synchronous>, transform_indices = @transform_3, window_bounds = array<i64: 16, 1>}, {pipeline_mode = #tpu.pipeline_mode<synchronous>, transform_indices = @transform_4, window_bounds = array<i64: 1, 32>}, {pipeline_mode = #tpu.pipeline_mode<synchronous>, transform_indices = @transform_5, window_bounds = array<i64: 1, 32>}, {transform_indices = @transform_6, window_bounds = array<i64: 1, 32, 96>}, {transform_indices = @transform_7, window_bounds = array<i64: 1, 1, 96>}, {transform_indices = @transform_8, window_bounds = array<i64: 1, 32, 32>}, {transform_indices = @transform_9, window_bounds = array<i64: 1, 1, 32>}, {transform_indices = @transform_10, window_bounds = array<i64: 1, 1, 32>}, {transform_indices = @transform_11, window_bounds = array<i64: 1, 1, 32>}, {transform_indices = @transform_12, window_bounds = array<i64: 1, 32, 64>}, {transform_indices = @transform_13, window_bounds = array<i64: 1, 1, 64>}, {transform_indices = @transform_14, window_bounds = array<i64: 1, 64, 32>}, {transform_indices = @transform_15, window_bounds = array<i64: 1, 1, 32>}, {transform_indices = @transform_16, window_bounds = array<i64: 1, 1, 32>}, {transform_indices = @transform_17, window_bounds = array<i64: 1, 1, 32>}, {pipeline_mode = #tpu.pipeline_mode<synchronous>, transform_indices = @transform_18, window_bounds = array<i64: 32, 128>}, {pipeline_mode = #tpu.pipeline_mode<synchronous>, transform_indices = @transform_19, window_bounds = array<i64: 1, 128>}, {pipeline_mode = #tpu.pipeline_mode<synchronous>, transform_indices = @transform_20, window_bounds = array<i64: 16, 128>}, {pipeline_mode = #tpu.pipeline_mode<synchronous>, transform_indices = @transform_21, window_bounds = array<i64: 1, 1>}]} {
    %c0_i32 = arith.constant 0 : i32
    %0 = arith.cmpi eq, %arg0, %c0_i32 : i32
    %1 = arith.extui %0 : i1 to i32
    %c0_i32_0 = arith.constant 0 : i32
    %2 = arith.cmpi ne, %1, %c0_i32_0 : i32
    scf.if %2 {
      %c0_74 = arith.constant 0 : index
      %c0_75 = arith.constant 0 : index
      %162 = vector.load %arg1[%c0_74, %c0_75] : memref<16x32xf32, #tpu.memory_space<vmem>>, vector<16x32xf32>
      %c0_76 = arith.constant 0 : index
      %c0_77 = arith.constant 0 : index
      %163 = vector.load %arg5[%c0_76, %c0_77] : memref<1x32xf32, #tpu.memory_space<vmem>>, vector<1x32xf32>
      %c0_78 = arith.constant 0 : index
      %c0_79 = arith.constant 0 : index
      %164 = vector.load %arg6[%c0_78, %c0_79] : memref<1x32xf32, #tpu.memory_space<vmem>>, vector<1x32xf32>
      %cst_80 = arith.constant dense<0.000000e+00> : vector<16xf32>
      %165 = vector.multi_reduction <add>, %162, %cst_80 [1] : vector<16x32xf32> to vector<16xf32>
      %166 = vector.shape_cast %165 : vector<16xf32> to vector<16x1xf32>
      %cst_81 = arith.constant 3.200000e+01 : f32
      %167 = vector.broadcast %cst_81 : f32 to vector<16x1xf32>
      %168 = arith.divf %166, %167 : vector<16x1xf32>
      %169 = vector.broadcast %168 : vector<16x1xf32> to vector<16x32xf32>
      %170 = arith.subf %162, %169 : vector<16x32xf32>
      %171 = arith.mulf %170, %170 : vector<16x32xf32>
      %cst_82 = arith.constant dense<0.000000e+00> : vector<16xf32>
      %172 = vector.multi_reduction <add>, %171, %cst_82 [1] : vector<16x32xf32> to vector<16xf32>
      %173 = vector.shape_cast %172 : vector<16xf32> to vector<16x1xf32>
      %cst_83 = arith.constant 3.200000e+01 : f32
      %174 = vector.broadcast %cst_83 : f32 to vector<16x1xf32>
      %175 = arith.divf %173, %174 : vector<16x1xf32>
      %cst_84 = arith.constant 1.000000e-07 : f32
      %176 = vector.broadcast %cst_84 : f32 to vector<16x1xf32>
      %177 = arith.addf %175, %176 : vector<16x1xf32>
      %178 = math.rsqrt %177 : vector<16x1xf32>
      %179 = vector.broadcast %178 : vector<16x1xf32> to vector<16x32xf32>
      %180 = arith.mulf %170, %179 : vector<16x32xf32>
      %181 = vector.broadcast %163 : vector<1x32xf32> to vector<16x32xf32>
      %182 = arith.mulf %180, %181 : vector<16x32xf32>
      %183 = vector.broadcast %164 : vector<1x32xf32> to vector<16x32xf32>
      %184 = arith.addf %182, %183 : vector<16x32xf32>
      %c0_85 = arith.constant 0 : index
      %c0_86 = arith.constant 0 : index
      %185 = vector.load %arg23[%c0_85, %c0_86] : memref<16x32xf32, #tpu.memory_space<vmem>>, vector<16x32xf32>
      tpu.vector_store %arg23[%c0_85, %c0_86], %184 {strides = array<i32>} : memref<16x32xf32, #tpu.memory_space<vmem>>, vector<16x32xf32>,
    } else {
    }
    %c0 = arith.constant 0 : index
    %c0_1 = arith.constant 0 : index
    %3 = vector.load %arg23[%c0, %c0_1] : memref<16x32xf32, #tpu.memory_space<vmem>>, vector<16x32xf32>
    %c0_2 = arith.constant 0 : index
    %c0_3 = arith.constant 0 : index
    %4 = vector.load %arg2[%c0_2, %c0_3] : memref<2x8xf32, #tpu.memory_space<vmem>>, vector<2x8xf32>
    %5 = arith.truncf %3 : vector<16x32xf32> to vector<16x32xbf16>
    %c0_4 = arith.constant 0 : index
    %c0_5 = arith.constant 0 : index
    %c0_6 = arith.constant 0 : index
    %6 = vector.load %arg7[%c0_4, %c0_5, %c0_6] : memref<1x32x96xbf16, #tpu.memory_space<vmem>>, vector<1x32x96xbf16>
    %7 = vector.shape_cast %6 : vector<1x32x96xbf16> to vector<32x96xbf16>
    %cst = arith.constant dense<0.000000e+00> : vector<16x96xf32>
    %8 = tpu.matmul %5, %7, %cst {dimension_numbers = #tpu.dot_dimension_numbers<[1], [0], [0], [1], [0, 0, 1, 1], [], []>} : vector<16x32xbf16>, vector<32x96xbf16>, vector<16x96xf32> -> vector<16x96xf32>
    %c0_7 = arith.constant 0 : index
    %c0_8 = arith.constant 0 : index
    %c0_9 = arith.constant 0 : index
    %9 = vector.load %arg8[%c0_7, %c0_8, %c0_9] : memref<1x1x96xf32, #tpu.memory_space<vmem>>, vector<1x1x96xf32>
    %10 = vector.shape_cast %9 : vector<1x1x96xf32> to vector<1x96xf32>
    %11 = vector.broadcast %10 : vector<1x96xf32> to vector<16x96xf32>
    %12 = arith.addf %8, %11 : vector<16x96xf32>
    %13 = arith.truncf %12 : vector<16x96xf32> to vector<16x96xbf16>
    %14 = vector.extract_strided_slice %4 {offsets = [0, 0], sizes = [1, 8], strides = [1, 1]} : vector<2x8xf32> to vector<1x8xf32>
    %15 = vector.extract_strided_slice %13 {offsets = [0, 0], sizes = [8, 16], strides = [1, 1]} : vector<16x96xbf16> to vector<8x16xbf16>
    %16 = vector.extract_strided_slice %13 {offsets = [0, 32], sizes = [8, 16], strides = [1, 1]} : vector<16x96xbf16> to vector<8x16xbf16>
    %cst_10 = arith.constant dense<0.000000e+00> : vector<8x8xf32>
    %17 = tpu.matmul %15, %16, %cst_10 {dimension_numbers = #tpu.dot_dimension_numbers<[1], [1], [0], [0], [0, 0, 1, 0], [], []>} : vector<8x16xbf16>, vector<8x16xbf16>, vector<8x8xf32> -> vector<8x8xf32>
    %cst_11 = arith.constant 2.500000e-01 : f32
    %18 = vector.broadcast %cst_11 : f32 to vector<8x8xf32>
    %19 = arith.mulf %17, %18 : vector<8x8xf32>
    %20 = vector.broadcast %14 : vector<1x8xf32> to vector<8x8xf32>
    %21 = arith.addf %19, %20 : vector<8x8xf32>
    %22 = vector.extract_strided_slice %13 {offsets = [0, 16], sizes = [8, 16], strides = [1, 1]} : vector<16x96xbf16> to vector<8x16xbf16>
    %23 = vector.extract_strided_slice %13 {offsets = [0, 48], sizes = [8, 16], strides = [1, 1]} : vector<16x96xbf16> to vector<8x16xbf16>
    %cst_12 = arith.constant dense<0.000000e+00> : vector<8x8xf32>
    %24 = tpu.matmul %22, %23, %cst_12 {dimension_numbers = #tpu.dot_dimension_numbers<[1], [1], [0], [0], [0, 0, 1, 0], [], []>} : vector<8x16xbf16>, vector<8x16xbf16>, vector<8x8xf32> -> vector<8x8xf32>
    %cst_13 = arith.constant 2.500000e-01 : f32
    %25 = vector.broadcast %cst_13 : f32 to vector<8x8xf32>
    %26 = arith.mulf %24, %25 : vector<8x8xf32>
    %27 = vector.broadcast %14 : vector<1x8xf32> to vector<8x8xf32>
    %28 = arith.addf %26, %27 : vector<8x8xf32>
    %29 = vector.extract_strided_slice %4 {offsets = [1, 0], sizes = [1, 8], strides = [1, 1]} : vector<2x8xf32> to vector<1x8xf32>
    %30 = vector.extract_strided_slice %13 {offsets = [8, 0], sizes = [8, 16], strides = [1, 1]} : vector<16x96xbf16> to vector<8x16xbf16>
    %31 = vector.extract_strided_slice %13 {offsets = [8, 32], sizes = [8, 16], strides = [1, 1]} : vector<16x96xbf16> to vector<8x16xbf16>
    %cst_14 = arith.constant dense<0.000000e+00> : vector<8x8xf32>
    %32 = tpu.matmul %30, %31, %cst_14 {dimension_numbers = #tpu.dot_dimension_numbers<[1], [1], [0], [0], [0, 0, 1, 0], [], []>} : vector<8x16xbf16>, vector<8x16xbf16>, vector<8x8xf32> -> vector<8x8xf32>
    %cst_15 = arith.constant 2.500000e-01 : f32
    %33 = vector.broadcast %cst_15 : f32 to vector<8x8xf32>
    %34 = arith.mulf %32, %33 : vector<8x8xf32>
    %35 = vector.broadcast %29 : vector<1x8xf32> to vector<8x8xf32>
    %36 = arith.addf %34, %35 : vector<8x8xf32>
    %37 = vector.extract_strided_slice %13 {offsets = [8, 16], sizes = [8, 16], strides = [1, 1]} : vector<16x96xbf16> to vector<8x16xbf16>
    %38 = vector.extract_strided_slice %13 {offsets = [8, 48], sizes = [8, 16], strides = [1, 1]} : vector<16x96xbf16> to vector<8x16xbf16>
    %cst_16 = arith.constant dense<0.000000e+00> : vector<8x8xf32>
    %39 = tpu.matmul %37, %38, %cst_16 {dimension_numbers = #tpu.dot_dimension_numbers<[1], [1], [0], [0], [0, 0, 1, 0], [], []>} : vector<8x16xbf16>, vector<8x16xbf16>, vector<8x8xf32> -> vector<8x8xf32>
    %cst_17 = arith.constant 2.500000e-01 : f32
    %40 = vector.broadcast %cst_17 : f32 to vector<8x8xf32>
    %41 = arith.mulf %39, %40 : vector<8x8xf32>
    %42 = vector.broadcast %29 : vector<1x8xf32> to vector<8x8xf32>
    %43 = arith.addf %41, %42 : vector<8x8xf32>
    %44 = tpu.concatenate %21, %28, %36, %43 in 0 : vector<8x8xf32>, vector<8x8xf32>, vector<8x8xf32>, vector<8x8xf32> -> vector<32x8xf32>
    %cst_18 = arith.constant dense<0xFF800000> : vector<32xf32>
    %45 = vector.multi_reduction <maximumf>, %44, %cst_18 [1] : vector<32x8xf32> to vector<32xf32>
    %46 = vector.shape_cast %45 : vector<32xf32> to vector<32x1xf32>
    %47 = vector.broadcast %46 : vector<32x1xf32> to vector<32x8xf32>
    %48 = arith.subf %44, %47 : vector<32x8xf32>
    %49 = math.exp %48 : vector<32x8xf32>
    %cst_19 = arith.constant dense<0.000000e+00> : vector<32xf32>
    %50 = vector.multi_reduction <add>, %49, %cst_19 [1] : vector<32x8xf32> to vector<32xf32>
    %51 = vector.shape_cast %50 : vector<32xf32> to vector<32x1xf32>
    %52 = tpu.reciprocal %51 {approx = true} : vector<32x1xf32> -> vector<32x1xf32>
    %53 = vector.broadcast %52 : vector<32x1xf32> to vector<32x8xf32>
    %54 = arith.mulf %49, %53 : vector<32x8xf32>
    %55 = arith.truncf %54 : vector<32x8xf32> to vector<32x8xbf16>
    %56 = vector.extract_strided_slice %55 {offsets = [0, 0], sizes = [8, 8], strides = [1, 1]} : vector<32x8xbf16> to vector<8x8xbf16>
    %57 = vector.extract_strided_slice %13 {offsets = [0, 64], sizes = [8, 16], strides = [1, 1]} : vector<16x96xbf16> to vector<8x16xbf16>
    %cst_20 = arith.constant dense<0.000000e+00> : vector<8x16xf32>
    %58 = tpu.matmul %56, %57, %cst_20 {dimension_numbers = #tpu.dot_dimension_numbers<[1], [0], [0], [1], [0, 0, 1, 1], [], []>} : vector<8x8xbf16>, vector<8x16xbf16>, vector<8x16xf32> -> vector<8x16xf32>
    %59 = vector.extract_strided_slice %55 {offsets = [8, 0], sizes = [8, 8], strides = [1, 1]} : vector<32x8xbf16> to vector<8x8xbf16>
    %60 = vector.extract_strided_slice %13 {offsets = [0, 80], sizes = [8, 16], strides = [1, 1]} : vector<16x96xbf16> to vector<8x16xbf16>
    %cst_21 = arith.constant dense<0.000000e+00> : vector<8x16xf32>
    %61 = tpu.matmul %59, %60, %cst_21 {dimension_numbers = #tpu.dot_dimension_numbers<[1], [0], [0], [1], [0, 0, 1, 1], [], []>} : vector<8x8xbf16>, vector<8x16xbf16>, vector<8x16xf32> -> vector<8x16xf32>
    %62 = tpu.concatenate %58, %61 in 1 : vector<8x16xf32>, vector<8x16xf32> -> vector<8x32xf32>
    %63 = vector.extract_strided_slice %55 {offsets = [16, 0], sizes = [8, 8], strides = [1, 1]} : vector<32x8xbf16> to vector<8x8xbf16>
    %64 = vector.extract_strided_slice %13 {offsets = [8, 64], sizes = [8, 16], strides = [1, 1]} : vector<16x96xbf16> to vector<8x16xbf16>
    %cst_22 = arith.constant dense<0.000000e+00> : vector<8x16xf32>
    %65 = tpu.matmul %63, %64, %cst_22 {dimension_numbers = #tpu.dot_dimension_numbers<[1], [0], [0], [1], [0, 0, 1, 1], [], []>} : vector<8x8xbf16>, vector<8x16xbf16>, vector<8x16xf32> -> vector<8x16xf32>
    %66 = vector.extract_strided_slice %55 {offsets = [24, 0], sizes = [8, 8], strides = [1, 1]} : vector<32x8xbf16> to vector<8x8xbf16>
    %67 = vector.extract_strided_slice %13 {offsets = [8, 80], sizes = [8, 16], strides = [1, 1]} : vector<16x96xbf16> to vector<8x16xbf16>
    %cst_23 = arith.constant dense<0.000000e+00> : vector<8x16xf32>
    %68 = tpu.matmul %66, %67, %cst_23 {dimension_numbers = #tpu.dot_dimension_numbers<[1], [0], [0], [1], [0, 0, 1, 1], [], []>} : vector<8x8xbf16>, vector<8x16xbf16>, vector<8x16xf32> -> vector<8x16xf32>
    %69 = tpu.concatenate %65, %68 in 1 : vector<8x16xf32>, vector<8x16xf32> -> vector<8x32xf32>
    %70 = tpu.concatenate %62, %69 in 0 : vector<8x32xf32>, vector<8x32xf32> -> vector<16x32xf32>
    %71 = arith.truncf %70 : vector<16x32xf32> to vector<16x32xbf16>
    %c0_24 = arith.constant 0 : index
    %c0_25 = arith.constant 0 : index
    %c0_26 = arith.constant 0 : index
    %72 = vector.load %arg9[%c0_24, %c0_25, %c0_26] : memref<1x32x32xbf16, #tpu.memory_space<vmem>>, vector<1x32x32xbf16>
    %73 = vector.shape_cast %72 : vector<1x32x32xbf16> to vector<32x32xbf16>
    %cst_27 = arith.constant dense<0.000000e+00> : vector<16x32xf32>
    %74 = tpu.matmul %71, %73, %cst_27 {dimension_numbers = #tpu.dot_dimension_numbers<[1], [0], [0], [1], [0, 0, 1, 1], [], []>} : vector<16x32xbf16>, vector<32x32xbf16>, vector<16x32xf32> -> vector<16x32xf32>
    %c0_28 = arith.constant 0 : index
    %c0_29 = arith.constant 0 : index
    %c0_30 = arith.constant 0 : index
    %75 = vector.load %arg10[%c0_28, %c0_29, %c0_30] : memref<1x1x32xf32, #tpu.memory_space<vmem>>, vector<1x1x32xf32>
    %76 = vector.shape_cast %75 : vector<1x1x32xf32> to vector<1x32xf32>
    %77 = vector.broadcast %76 : vector<1x32xf32> to vector<16x32xf32>
    %78 = arith.addf %74, %77 : vector<16x32xf32>
    %79 = arith.addf %3, %78 : vector<16x32xf32>
    %c0_31 = arith.constant 0 : index
    %c0_32 = arith.constant 0 : index
    %c0_33 = arith.constant 0 : index
    %80 = vector.load %arg11[%c0_31, %c0_32, %c0_33] : memref<1x1x32xf32, #tpu.memory_space<vmem>>, vector<1x1x32xf32>
    %81 = vector.shape_cast %80 : vector<1x1x32xf32> to vector<1x32xf32>
    %c0_34 = arith.constant 0 : index
    %c0_35 = arith.constant 0 : index
    %c0_36 = arith.constant 0 : index
    %82 = vector.load %arg12[%c0_34, %c0_35, %c0_36] : memref<1x1x32xf32, #tpu.memory_space<vmem>>, vector<1x1x32xf32>
    %83 = vector.shape_cast %82 : vector<1x1x32xf32> to vector<1x32xf32>
    %cst_37 = arith.constant dense<0.000000e+00> : vector<16xf32>
    %84 = vector.multi_reduction <add>, %79, %cst_37 [1] : vector<16x32xf32> to vector<16xf32>
    %85 = vector.shape_cast %84 : vector<16xf32> to vector<16x1xf32>
    %cst_38 = arith.constant 3.200000e+01 : f32
    %86 = vector.broadcast %cst_38 : f32 to vector<16x1xf32>
    %87 = arith.divf %85, %86 : vector<16x1xf32>
    %88 = vector.broadcast %87 : vector<16x1xf32> to vector<16x32xf32>
    %89 = arith.subf %79, %88 : vector<16x32xf32>
    %90 = arith.mulf %89, %89 : vector<16x32xf32>
    %cst_39 = arith.constant dense<0.000000e+00> : vector<16xf32>
    %91 = vector.multi_reduction <add>, %90, %cst_39 [1] : vector<16x32xf32> to vector<16xf32>
    %92 = vector.shape_cast %91 : vector<16xf32> to vector<16x1xf32>
    %cst_40 = arith.constant 3.200000e+01 : f32
    %93 = vector.broadcast %cst_40 : f32 to vector<16x1xf32>
    %94 = arith.divf %92, %93 : vector<16x1xf32>
    %cst_41 = arith.constant 1.000000e-07 : f32
    %95 = vector.broadcast %cst_41 : f32 to vector<16x1xf32>
    %96 = arith.addf %94, %95 : vector<16x1xf32>
    %97 = math.rsqrt %96 : vector<16x1xf32>
    %98 = vector.broadcast %97 : vector<16x1xf32> to vector<16x32xf32>
    %99 = arith.mulf %89, %98 : vector<16x32xf32>
    %100 = vector.broadcast %81 : vector<1x32xf32> to vector<16x32xf32>
    %101 = arith.mulf %99, %100 : vector<16x32xf32>
    %102 = vector.broadcast %83 : vector<1x32xf32> to vector<16x32xf32>
    %103 = arith.addf %101, %102 : vector<16x32xf32>
    %104 = arith.truncf %103 : vector<16x32xf32> to vector<16x32xbf16>
    %c0_42 = arith.constant 0 : index
    %c0_43 = arith.constant 0 : index
    %c0_44 = arith.constant 0 : index
    %105 = vector.load %arg13[%c0_42, %c0_43, %c0_44] : memref<1x32x64xbf16, #tpu.memory_space<vmem>>, vector<1x32x64xbf16>
    %106 = vector.shape_cast %105 : vector<1x32x64xbf16> to vector<32x64xbf16>
    %cst_45 = arith.constant dense<0.000000e+00> : vector<16x64xf32>
    %107 = tpu.matmul %104, %106, %cst_45 {dimension_numbers = #tpu.dot_dimension_numbers<[1], [0], [0], [1], [0, 0, 1, 1], [], []>} : vector<16x32xbf16>, vector<32x64xbf16>, vector<16x64xf32> -> vector<16x64xf32>
    %c0_46 = arith.constant 0 : index
    %c0_47 = arith.constant 0 : index
    %c0_48 = arith.constant 0 : index
    %108 = vector.load %arg14[%c0_46, %c0_47, %c0_48] : memref<1x1x64xf32, #tpu.memory_space<vmem>>, vector<1x1x64xf32>
    %109 = vector.shape_cast %108 : vector<1x1x64xf32> to vector<1x64xf32>
    %110 = vector.broadcast %109 : vector<1x64xf32> to vector<16x64xf32>
    %111 = arith.addf %107, %110 : vector<16x64xf32>
    %112 = arith.mulf %111, %111 : vector<16x64xf32>
    %113 = arith.mulf %111, %112 : vector<16x64xf32>
    %cst_49 = arith.constant 4.471500e-02 : f32
    %114 = vector.broadcast %cst_49 : f32 to vector<16x64xf32>
    %115 = arith.mulf %114, %113 : vector<16x64xf32>
    %116 = arith.addf %111, %115 : vector<16x64xf32>
    %cst_50 = arith.constant 0.797884583 : f32
    %117 = vector.broadcast %cst_50 : f32 to vector<16x64xf32>
    %118 = arith.mulf %117, %116 : vector<16x64xf32>
    %119 = math.tanh %118 : vector<16x64xf32>
    %cst_51 = arith.constant 1.000000e+00 : f32
    %120 = vector.broadcast %cst_51 : f32 to vector<16x64xf32>
    %121 = arith.addf %120, %119 : vector<16x64xf32>
    %cst_52 = arith.constant 5.000000e-01 : f32
    %122 = vector.broadcast %cst_52 : f32 to vector<16x64xf32>
    %123 = arith.mulf %122, %121 : vector<16x64xf32>
    %124 = arith.mulf %111, %123 : vector<16x64xf32>
    %125 = arith.truncf %124 : vector<16x64xf32> to vector<16x64xbf16>
    %c0_53 = arith.constant 0 : index
    %c0_54 = arith.constant 0 : index
    %c0_55 = arith.constant 0 : index
    %126 = vector.load %arg15[%c0_53, %c0_54, %c0_55] : memref<1x64x32xbf16, #tpu.memory_space<vmem>>, vector<1x64x32xbf16>
    %127 = vector.shape_cast %126 : vector<1x64x32xbf16> to vector<64x32xbf16>
    %cst_56 = arith.constant dense<0.000000e+00> : vector<16x32xf32>
    %128 = tpu.matmul %125, %127, %cst_56 {dimension_numbers = #tpu.dot_dimension_numbers<[1], [0], [0], [1], [0, 0, 1, 1], [], []>} : vector<16x64xbf16>, vector<64x32xbf16>, vector<16x32xf32> -> vector<16x32xf32>
    %c0_57 = arith.constant 0 : index
    %c0_58 = arith.constant 0 : index
    %c0_59 = arith.constant 0 : index
    %129 = vector.load %arg16[%c0_57, %c0_58, %c0_59] : memref<1x1x32xf32, #tpu.memory_space<vmem>>, vector<1x1x32xf32>
    %130 = vector.shape_cast %129 : vector<1x1x32xf32> to vector<1x32xf32>
    %131 = vector.broadcast %130 : vector<1x32xf32> to vector<16x32xf32>
    %132 = arith.addf %128, %131 : vector<16x32xf32>
    %133 = arith.addf %103, %132 : vector<16x32xf32>
    %c0_60 = arith.constant 0 : index
    %c0_61 = arith.constant 0 : index
    %c0_62 = arith.constant 0 : index
    %134 = vector.load %arg17[%c0_60, %c0_61, %c0_62] : memref<1x1x32xf32, #tpu.memory_space<vmem>>, vector<1x1x32xf32>
    %135 = vector.shape_cast %134 : vector<1x1x32xf32> to vector<1x32xf32>
    %c0_63 = arith.constant 0 : index
    %c0_64 = arith.constant 0 : index
    %c0_65 = arith.constant 0 : index
    %136 = vector.load %arg18[%c0_63, %c0_64, %c0_65] : memref<1x1x32xf32, #tpu.memory_space<vmem>>, vector<1x1x32xf32>
    %137 = vector.shape_cast %136 : vector<1x1x32xf32> to vector<1x32xf32>
    %cst_66 = arith.constant dense<0.000000e+00> : vector<16xf32>
    %138 = vector.multi_reduction <add>, %133, %cst_66 [1] : vector<16x32xf32> to vector<16xf32>
    %139 = vector.shape_cast %138 : vector<16xf32> to vector<16x1xf32>
    %cst_67 = arith.constant 3.200000e+01 : f32
    %140 = vector.broadcast %cst_67 : f32 to vector<16x1xf32>
    %141 = arith.divf %139, %140 : vector<16x1xf32>
    %142 = vector.broadcast %141 : vector<16x1xf32> to vector<16x32xf32>
    %143 = arith.subf %133, %142 : vector<16x32xf32>
    %144 = arith.mulf %143, %143 : vector<16x32xf32>
    %cst_68 = arith.constant dense<0.000000e+00> : vector<16xf32>
    %145 = vector.multi_reduction <add>, %144, %cst_68 [1] : vector<16x32xf32> to vector<16xf32>
    %146 = vector.shape_cast %145 : vector<16xf32> to vector<16x1xf32>
    %cst_69 = arith.constant 3.200000e+01 : f32
    %147 = vector.broadcast %cst_69 : f32 to vector<16x1xf32>
    %148 = arith.divf %146, %147 : vector<16x1xf32>
    %cst_70 = arith.constant 1.000000e-07 : f32
    %149 = vector.broadcast %cst_70 : f32 to vector<16x1xf32>
    %150 = arith.addf %148, %149 : vector<16x1xf32>
    %151 = math.rsqrt %150 : vector<16x1xf32>
    %152 = vector.broadcast %151 : vector<16x1xf32> to vector<16x32xf32>
    %153 = arith.mulf %143, %152 : vector<16x32xf32>
    %154 = vector.broadcast %135 : vector<1x32xf32> to vector<16x32xf32>
    %155 = arith.mulf %153, %154 : vector<16x32xf32>
    %156 = vector.broadcast %137 : vector<1x32xf32> to vector<16x32xf32>
    %157 = arith.addf %155, %156 : vector<16x32xf32>
    %c0_71 = arith.constant 0 : index
    %c0_72 = arith.constant 0 : index
    %158 = vector.load %arg23[%c0_71, %c0_72] : memref<16x32xf32, #tpu.memory_space<vmem>>, vector<16x32xf32>
    tpu.vector_store %arg23[%c0_71, %c0_72], %157 {strides = array<i32>} : memref<16x32xf32, #tpu.memory_space<vmem>>, vector<16x32xf32>,
    %c1_i32 = arith.constant 1 : i32
    %159 = arith.cmpi eq, %arg0, %c1_i32 : i32
    %160 = arith.extui %159 : i1 to i32
    %c0_i32_73 = arith.constant 0 : i32
    %161 = arith.cmpi ne, %160, %c0_i32_73 : i32
    scf.if %161 {
      %162 = arith.truncf %157 : vector<16x32xf32> to vector<16x32xbf16>
      %c0_74 = arith.constant 0 : index
      %c0_75 = arith.constant 0 : index
      %163 = vector.load %arg19[%c0_74, %c0_75] : memref<32x128xbf16, #tpu.memory_space<vmem>>, vector<32x128xbf16>
      %cst_76 = arith.constant dense<0.000000e+00> : vector<16x128xf32>
      %164 = tpu.matmul %162, %163, %cst_76 {dimension_numbers = #tpu.dot_dimension_numbers<[1], [0], [0], [1], [0, 0, 1, 1], [], []>} : vector<16x32xbf16>, vector<32x128xbf16>, vector<16x128xf32> -> vector<16x128xf32>
      %c0_77 = arith.constant 0 : index
      %c0_78 = arith.constant 0 : index
      %165 = vector.load %arg20[%c0_77, %c0_78] : memref<1x128xf32, #tpu.memory_space<vmem>>, vector<1x128xf32>
      %166 = vector.broadcast %165 : vector<1x128xf32> to vector<16x128xf32>
      %167 = arith.addf %164, %166 : vector<16x128xf32>
      %c0_79 = arith.constant 0 : index
      %c0_80 = arith.constant 0 : index
      %168 = vector.load %arg21[%c0_79, %c0_80] : memref<16x128xf32, #tpu.memory_space<vmem>>, vector<16x128xf32>
      tpu.vector_store %arg21[%c0_79, %c0_80], %167 {strides = array<i32>} : memref<16x128xf32, #tpu.memory_space<vmem>>, vector<16x128xf32>,
      %169 = tpu.iota {dimensions = array<i32: 1>} : vector<1x128xi32>
      %c5_i32 = arith.constant 5 : i32
      %170 = vector.broadcast %c5_i32 : i32 to vector<1x128xi32>
      %171 = arith.cmpi slt, %169, %170 : vector<1x128xi32>
      %cst_81 = arith.constant -1.000000e+30 : f32
      %172 = vector.shape_cast %171 : vector<1x128xi1> to vector<1x128xi1>
      %173 = vector.broadcast %172 : vector<1x128xi1> to vector<16x128xi1>
      %174 = vector.broadcast %cst_81 : f32 to vector<16x128xf32>
      %175 = arith.select %173, %167, %174 : vector<16x128xi1>, vector<16x128xf32>
      %cst_82 = arith.constant dense<0xFF800000> : vector<16xf32>
      %176 = vector.multi_reduction <maximumf>, %175, %cst_82 [1] : vector<16x128xf32> to vector<16xf32>
      %177 = vector.shape_cast %176 : vector<16xf32> to vector<16x1xf32>
      %178 = vector.broadcast %177 : vector<16x1xf32> to vector<16x128xf32>
      %179 = arith.subf %175, %178 : vector<16x128xf32>
      %180 = math.exp %179 : vector<16x128xf32>
      %cst_83 = arith.constant dense<0.000000e+00> : vector<16xf32>
      %181 = vector.multi_reduction <add>, %180, %cst_83 [1] : vector<16x128xf32> to vector<16xf32>
      %182 = vector.shape_cast %181 : vector<16xf32> to vector<16x1xf32>
      %183 = math.log %182 : vector<16x1xf32>
      %184 = arith.addf %177, %183 : vector<16x1xf32>
      %c0_84 = arith.constant 0 : index
      %c0_85 = arith.constant 0 : index
      %185 = vector.load %arg3[%c0_84, %c0_85] : memref<16x128xf32, #tpu.memory_space<vmem>>, vector<16x128xf32>
      %186 = arith.mulf %185, %167 : vector<16x128xf32>
      %cst_86 = arith.constant dense<0.000000e+00> : vector<16xf32>
      %187 = vector.multi_reduction <add>, %186, %cst_86 [1] : vector<16x128xf32> to vector<16xf32>
      %188 = vector.shape_cast %187 : vector<16xf32> to vector<16x1xf32>
      %189 = arith.subf %184, %188 : vector<16x1xf32>
      %c0_87 = arith.constant 0 : index
      %c0_88 = arith.constant 0 : index
      %190 = vector.load %arg4[%c0_87, %c0_88] : memref<16x1xf32, #tpu.memory_space<vmem>>, vector<16x1xf32>
      %191 = arith.mulf %189, %190 : vector<16x1xf32>
      %192 = vector.shape_cast %191 : vector<16x1xf32> to vector<1x16x1xf32>
      %cst_89 = arith.constant dense<0.000000e+00> : vector<1xf32>
      %193 = vector.multi_reduction <add>, %192, %cst_89 [1, 2] : vector<1x16x1xf32> to vector<1xf32>
      %194 = vector.shape_cast %193 : vector<1xf32> to vector<1x1x1xf32>
      %195 = vector.extract %194[0, 0, 0] : f32 from vector<1x1x1xf32>
      %196 = vector.broadcast %195 : f32 to vector<1x1xf32>
      %197 = vector.shape_cast %190 : vector<16x1xf32> to vector<1x16x1xf32>
      %cst_90 = arith.constant dense<0.000000e+00> : vector<1xf32>
      %198 = vector.multi_reduction <add>, %197, %cst_90 [1, 2] : vector<1x16x1xf32> to vector<1xf32>
      %199 = vector.shape_cast %198 : vector<1xf32> to vector<1x1x1xf32>
      %200 = vector.extract %199[0, 0, 0] : f32 from vector<1x1x1xf32>
      %201 = vector.broadcast %200 : f32 to vector<1x1xf32>
      %cst_91 = arith.constant 1.000000e+00 : f32
      %202 = vector.broadcast %cst_91 : f32 to vector<1x1xf32>
      %203 = arith.maximumf %201, %202 : vector<1x1xf32>
      %204 = arith.divf %196, %203 : vector<1x1xf32>
      %c0_92 = arith.constant 0 : index
      %c0_93 = arith.constant 0 : index
      %205 = vector.load %arg22[%c0_92, %c0_93] : memref<1x1xf32, #tpu.memory_space<vmem>>, vector<1x1xf32>
      tpu.vector_store %arg22[%c0_92, %c0_93], %204 {strides = array<i32>} : memref<1x1xf32, #tpu.memory_space<vmem>>, vector<1x1xf32>,
    } else {
    }
    return
  }
  func.func @transform_0(%arg0: i32) -> (i32, i32) {
    %c0_i32 = arith.constant 0 : i32
    %c0_i32_0 = arith.constant 0 : i32
    %c0_i32_1 = arith.constant 0 : i32
    return %c0_i32, %c0_i32_0 : i32, i32
  }
  func.func @transform_1(%arg0: i32) -> (i32, i32) {
    %c0_i32 = arith.constant 0 : i32
    %c0_i32_0 = arith.constant 0 : i32
    %c0_i32_1 = arith.constant 0 : i32
    return %c0_i32, %c0_i32_0 : i32, i32
  }
  func.func @transform_2(%arg0: i32) -> (i32, i32) {
    %c0_i32 = arith.constant 0 : i32
    %c0_i32_0 = arith.constant 0 : i32
    %c0_i32_1 = arith.constant 0 : i32
    return %c0_i32, %c0_i32_0 : i32, i32
  }
  func.func @transform_3(%arg0: i32) -> (i32, i32) {
    %c0_i32 = arith.constant 0 : i32
    %c0_i32_0 = arith.constant 0 : i32
    %c0_i32_1 = arith.constant 0 : i32
    return %c0_i32, %c0_i32_0 : i32, i32
  }
  func.func @transform_4(%arg0: i32) -> (i32, i32) {
    %c0_i32 = arith.constant 0 : i32
    %c0_i32_0 = arith.constant 0 : i32
    %c0_i32_1 = arith.constant 0 : i32
    return %c0_i32, %c0_i32_0 : i32, i32
  }
  func.func @transform_5(%arg0: i32) -> (i32, i32) {
    %c0_i32 = arith.constant 0 : i32
    %c0_i32_0 = arith.constant 0 : i32
    %c0_i32_1 = arith.constant 0 : i32
    return %c0_i32, %c0_i32_0 : i32, i32
  }
  func.func @transform_6(%arg0: i32) -> (i32, i32, i32) {
    %c0_i32 = arith.constant 0 : i32
    %c0_i32_0 = arith.constant 0 : i32
    %c0_i32_1 = arith.constant 0 : i32
    return %arg0, %c0_i32, %c0_i32_0 : i32, i32, i32
  }
  func.func @transform_7(%arg0: i32) -> (i32, i32, i32) {
    %c0_i32 = arith.constant 0 : i32
    %c0_i32_0 = arith.constant 0 : i32
    %c0_i32_1 = arith.constant 0 : i32
    return %arg0, %c0_i32, %c0_i32_0 : i32, i32, i32
  }
  func.func @transform_8(%arg0: i32) -> (i32, i32, i32) {
    %c0_i32 = arith.constant 0 : i32
    %c0_i32_0 = arith.constant 0 : i32
    %c0_i32_1 = arith.constant 0 : i32
    return %arg0, %c0_i32, %c0_i32_0 : i32, i32, i32
  }
  func.func @transform_9(%arg0: i32) -> (i32, i32, i32) {
    %c0_i32 = arith.constant 0 : i32
    %c0_i32_0 = arith.constant 0 : i32
    %c0_i32_1 = arith.constant 0 : i32
    return %arg0, %c0_i32, %c0_i32_0 : i32, i32, i32
  }
  func.func @transform_10(%arg0: i32) -> (i32, i32, i32) {
    %c0_i32 = arith.constant 0 : i32
    %c0_i32_0 = arith.constant 0 : i32
    %c0_i32_1 = arith.constant 0 : i32
    return %arg0, %c0_i32, %c0_i32_0 : i32, i32, i32
  }
  func.func @transform_11(%arg0: i32) -> (i32, i32, i32) {
    %c0_i32 = arith.constant 0 : i32
    %c0_i32_0 = arith.constant 0 : i32
    %c0_i32_1 = arith.constant 0 : i32
    return %arg0, %c0_i32, %c0_i32_0 : i32, i32, i32
  }
  func.func @transform_12(%arg0: i32) -> (i32, i32, i32) {
    %c0_i32 = arith.constant 0 : i32
    %c0_i32_0 = arith.constant 0 : i32
    %c0_i32_1 = arith.constant 0 : i32
    return %arg0, %c0_i32, %c0_i32_0 : i32, i32, i32
  }
  func.func @transform_13(%arg0: i32) -> (i32, i32, i32) {
    %c0_i32 = arith.constant 0 : i32
    %c0_i32_0 = arith.constant 0 : i32
    %c0_i32_1 = arith.constant 0 : i32
    return %arg0, %c0_i32, %c0_i32_0 : i32, i32, i32
  }
  func.func @transform_14(%arg0: i32) -> (i32, i32, i32) {
    %c0_i32 = arith.constant 0 : i32
    %c0_i32_0 = arith.constant 0 : i32
    %c0_i32_1 = arith.constant 0 : i32
    return %arg0, %c0_i32, %c0_i32_0 : i32, i32, i32
  }
  func.func @transform_15(%arg0: i32) -> (i32, i32, i32) {
    %c0_i32 = arith.constant 0 : i32
    %c0_i32_0 = arith.constant 0 : i32
    %c0_i32_1 = arith.constant 0 : i32
    return %arg0, %c0_i32, %c0_i32_0 : i32, i32, i32
  }
  func.func @transform_16(%arg0: i32) -> (i32, i32, i32) {
    %c0_i32 = arith.constant 0 : i32
    %c0_i32_0 = arith.constant 0 : i32
    %c0_i32_1 = arith.constant 0 : i32
    return %arg0, %c0_i32, %c0_i32_0 : i32, i32, i32
  }
  func.func @transform_17(%arg0: i32) -> (i32, i32, i32) {
    %c0_i32 = arith.constant 0 : i32
    %c0_i32_0 = arith.constant 0 : i32
    %c0_i32_1 = arith.constant 0 : i32
    return %arg0, %c0_i32, %c0_i32_0 : i32, i32, i32
  }
  func.func @transform_18(%arg0: i32) -> (i32, i32) {
    %c0_i32 = arith.constant 0 : i32
    %c0_i32_0 = arith.constant 0 : i32
    %c0_i32_1 = arith.constant 0 : i32
    return %c0_i32, %c0_i32_0 : i32, i32
  }
  func.func @transform_19(%arg0: i32) -> (i32, i32) {
    %c0_i32 = arith.constant 0 : i32
    %c0_i32_0 = arith.constant 0 : i32
    %c0_i32_1 = arith.constant 0 : i32
    return %c0_i32, %c0_i32_0 : i32, i32
  }
  func.func @transform_20(%arg0: i32) -> (i32, i32) {
    %c0_i32 = arith.constant 0 : i32
    %c0_i32_0 = arith.constant 0 : i32
    %c0_i32_1 = arith.constant 0 : i32
    return %c0_i32, %c0_i32_0 : i32, i32
  }
  func.func @transform_21(%arg0: i32) -> (i32, i32) {
    %c0_i32 = arith.constant 0 : i32
    %c0_i32_0 = arith.constant 0 : i32
    %c0_i32_1 = arith.constant 0 : i32
    return %c0_i32, %c0_i32_0 : i32, i32
  }
}

</mosaic_0001>

<bundles_post_ra>
// kernel: custom_bert_forward.1
= control target key start
LH: loop header
LB: loop body
LE: loop exit
PB: predicated region body
PF: predicated region fallthrough
CT: control target
= control target key end

     0   :  { %s2341_s0 = inlined_call_operand.vmem [shape: f32[16,32], index: 0, kind: input, shape index: {}]   ;;  %s2342_s1 = inlined_call_operand.vmem [shape: f32[2,8], index: 1, kind: input, shape index: {}]   ;;  %s2343_s2 = inlined_call_operand.vmem [shape: f32[16,128], index: 2, kind: input, shape index: {}]   ;;  %s2344_s3 = inlined_call_operand.vmem [shape: f32[16,1], index: 3, kind: input, shape index: {}]   ;;  %s2345_s4 = inlined_call_operand.vmem [shape: f32[1,32], index: 4, kind: input, shape index: {}]   ;;  %s2346_s5 = inlined_call_operand.vmem [shape: f32[1,32], index: 5, kind: input, shape index: {}]   ;;  %s2347_s6 = inlined_call_operand.vmem [shape: bf16[2,32,96], index: 6, kind: input, shape index: {}]   ;;  %s2348_s7 = inlined_call_operand.vmem [shape: f32[2,1,96], index: 7, kind: input, shape index: {}]   ;;  %s2349_s8 = inlined_call_operand.vmem [shape: bf16[2,32,32], index: 8, kind: input, shape index: {}]   ;;  %s2350_s9 = inlined_call_operand.vmem [shape: f32[2,1,32], index: 9, kind: input, shape index: {}]   ;;  %s2351_s10 = inlined_call_operand.vmem [shape: f32[2,1,32], index: 10, kind: input, shape index: {}]   ;;  %s2352_s11 = inlined_call_operand.vmem [shape: f32[2,1,32], index: 11, kind: input, shape index: {}]   ;;  %s2353_s12 = inlined_call_operand.vmem [shape: bf16[2,32,64], index: 12, kind: input, shape index: {}]   ;;  %s2354_s13 = inlined_call_operand.vmem [shape: f32[2,1,64], index: 13, kind: input, shape index: {}]   ;;  %s2355_s14 = inlined_call_operand.vmem [shape: bf16[2,64,32], index: 14, kind: input, shape index: {}]   ;;  %s2356_s15 = inlined_call_operand.vmem [shape: f32[2,1,32], index: 15, kind: input, shape index: {}]   ;;  %s2357_s16 = inlined_call_operand.vmem [shape: f32[2,1,32], index: 16, kind: input, shape index: {}]   ;;  %s2358_s17 = inlined_call_operand.vmem [shape: f32[2,1,32], index: 17, kind: input, shape index: {}]   ;;  %s2359_s18 = inlined_call_operand.vmem [shape: bf16[32,128], index: 18, kind: input, shape index: {}]   ;;  %s2360_s19 = inlined_call_operand.vmem [shape: f32[1,128], index: 19, kind: input, shape index: {}]   ;;  %s2361_s20 = inlined_call_operand.vmem [shape: f32[16,128], index: 20, kind: output, shape index: {0}]   ;;  %s2362_s21 = inlined_call_operand.hbm [shape: f32[1,1], index: 21, kind: output, shape index: {1}]  }
   0x1   :  { %2369 = sst [smem:[#allocation7_spill]] %s2341_s0 }
   0x2   :  { %2370 = sst [smem:[#allocation8_spill]] %s2342_s1 }
   0x3   :  { %2371 = sst [smem:[#allocation9_spill]] %s2343_s2 }
   0x4   :  { %2372 = sst [smem:[#allocation10_spill]] %s2344_s3 }
   0x5   :  { %2373 = sst [smem:[#allocation11_spill]] %s2345_s4 }
   0x6   :  { %2374 = sst [smem:[#allocation12_spill]] %s2346_s5 }
   0x7   :  { %2375 = sst [smem:[#allocation13_spill]] %s2347_s6 }
   0x8   :  { %2376 = sst [smem:[#allocation14_spill]] %s2349_s8 }
   0x9   :  { %2377 = sst [smem:[#allocation15_spill]] %s2359_s18 }
   0xa   :  { %2378 = sst [smem:[#allocation16_spill]] %s2360_s19 }
   0xb   :  { %2379 = sst [smem:[#allocation17_spill]] %s2361_s20 }
   0xc   :  { %2380 = sst [smem:[#allocation18_spill]] %s2362_s21 }
   0xd   :  { %27 = vsyncpa [#allocation4], 0  ;;  %s2088_s2 = smov 0  }
   0xe LB: > { %2381 = sst [smem:[#allocation6_spill]] %s1967_s2  ;;  %s2094_s25 = sadd.s32 4294967295, %s1967_s2   ;;  %s1967_s2 = sphi %s2088_s2, %s33_s2  }
   0xf   : > { %p1748_p0 = scmp.ge.s32.totalorder %s1967_s2, 1  ;;  %p675_p1 = scmp.lt.s32.totalorder %s1967_s2, 3 }
  0x11   : > { %p676_p2 = pnand %p1748_p0, %p675_p1 }
  0x12   : > { %p769_p3 = scmp.lt.s32.totalorder (!%p676_p2), %s2094_s25, 1  ;;  %s2382_s6 = sld [smem:[#allocation13_spill]] (!%p676_p2) }
  0x13   : > { %679 = sbr.rel (%p676_p2) target bundleno = 2816 (0xb00), region = 100  ;;  %s2383_s8 = sld [smem:[#allocation14_spill]] (!%p676_p2) }
  0x14   : > { %p1757_p4 = scmp.ne.s32.totalorder (!%p676_p2), %s2094_s25, 0 }
  0x18   : > { %s2100_s26 = scalar_select %p769_p3, %s2094_s25, 1 }
  0x19   : > { %s2384_s1 = sld [smem:[#allocation7_spill]] (!%p1757_p4) }
  0x1a   : > { %s1824_s27 = sshll.u32 %s2100_s26, 4  ;;  %s1827_s18 = sshll.u32 %s2100_s26, 5 }
  0x1b   : > { %s2110_s30 = scalar_lea.vmem %s2382_s6, %s1824_s27  ;;  %s2115_s23 = scalar_lea.vmem %s2383_s8, %s1824_s27 }
  0x1c   : > { %s2132_s6 = scalar_lea.vmem %s2353_s12, %s1824_s27  ;;  %s798_s8 = scalar_lea.vmem %s2354_s13, %s2100_s26 }
  0x1d   : > { %s2142_s2 = scalar_lea.vmem %s2355_s14, %s1827_s18  ;;  %s806_s3 = scalar_lea.vmem %s2356_s15, %s2100_s26 }
  0x1e   : > { %s809_s0 = scalar_lea.vmem %s2357_s16, %s2100_s26  ;;  %s812_s19 = scalar_lea.vmem %s2358_s17, %s2100_s26 }
  0x1f   : > { %817 = sbr.rel (%p1757_p4) target bundleno = 314 (0x13a), region = 104  ;;  %s2385_s21 = sld [smem:[#allocation11_spill]] (!%p1757_p4) }
  0x20   : > { %s2386_s4 = sld [smem:[#allocation12_spill]] (!%p1757_p4) }
  0x24   : > { %v818_v0 = vld [vmem:[%s2384_s1] sm:$0xff]  ;;  %vm822_vm0 = vcmask 261120   ;;  %v819_v2 = vld [vmem:[%s2384_s1 + $0x8] sm:$0xff]  ;;  %v1969_v4 = vmov 32.0  }
  0x25   : > { %v823_v1 = vsel %vm822_vm0, %v818_v0, 0.0  ;;  %v826_v3 = vsel %vm822_vm0, %v819_v2, 0.0  ;;  %1869 = vrcp.f32 %v1969_v4  ;;  %v1867_v35 = vld [vmem:[%s2385_s21] ss:$0 sm:$0xff] }
  0x26   : > { %824 = vadd.xlane.f32.xlu0 %v823_v1  ;;  %v1868_v38 = vld [vmem:[%s2386_s4] ss:$0 sm:$0xff] }
  0x2b   : > { %v1870_v5 = vpop.eup %1869 }
  0x2c   : > { %v830_v6 = vmul.f32 32.0, %v1870_v5  ;;  %vm834_vm1 = vweird.f32 %v1870_v5 }
  0x2e   : > { %827 = vadd.xlane.f32.xlu0 %v826_v3  ;;  %v831_v7 = vsub.f32 1.0, %v830_v6 }
  0x30   : > { %v832_v8 = vmul.f32 %v1870_v5, %v831_v7 }
  0x32   : > { %v833_v9 = vadd.f32 %v1870_v5, %v832_v8 }
  0x34   : > { %v835_v10 = vsel %vm834_vm1, %v1870_v5, %v833_v9 }
  0x99   : > { %v825_v11 = vpop.xlane.xlu0 %824 }
  0x9a   : > { %v836_v12 = vmul.f32 %v835_v10, %v825_v11 }
  0x9c   : > { %v838_v13 = vsub.f32 %v818_v0, %v836_v12 }
  0x9e   : > { %v840_v14 = vmul.f32 %v838_v13, %v838_v13 }
  0xa0   : > { %v842_v15 = vsel %vm822_vm0, %v840_v14, 0.0 }
  0xa1   : > { %843 = vadd.xlane.f32.xlu1 %v842_v15  ;;  %v828_v16 = vpop.xlane.xlu0 %827 }
  0xa2   : > { %v837_v17 = vmul.f32 %v835_v10, %v828_v16 }
  0xa4   : > { %v839_v18 = vsub.f32 %v819_v2, %v837_v17 }
  0xa6   : > { %v841_v19 = vmul.f32 %v839_v18, %v839_v18 }
  0xa8   : > { %v845_v20 = vsel %vm822_vm0, %v841_v19, 0.0 }
  0xa9   : > { %846 = vadd.xlane.f32.xlu1 %v845_v20 }
 0x114   : > { %v844_v21 = vpop.xlane.xlu1 %843 }
 0x115   : > { %v848_v22 = vmul.f32 %v844_v21, %v835_v10 }
 0x117   : > { %v850_v23 = vadd.f32 1e-07, %v848_v22 }
 0x119   : > { %1871 = vrsqrt.f32 %v850_v23  ;;  %vm858_vm3 = vweird.f32 %v850_v23 }
 0x11c   : > { %v847_v24 = vpop.xlane.xlu1 %846 }
 0x11d   : > { %v849_v25 = vmul.f32 %v847_v24, %v835_v10 }
 0x11f   : > { %v1872_v26 = vpop.eup %1871  ;;  %v851_v27 = vadd.f32 1e-07, %v849_v25 }
 0x120   : > { %v853_v28 = vmul.f32 %v1872_v26, %v850_v23  ;;  %vm859_vm2 = vweird.f32 %v1872_v26 }
 0x121   : > { %1873 = vrsqrt.f32 %v851_v27  ;;  %vm860_vm4 = vmor %vm858_vm3, %vm859_vm2  ;;  %vm868_vm6 = vweird.f32 %v851_v27 }
 0x122   : > { %v854_v29 = vmul.f32 %v1872_v26, %v853_v28 }
 0x124   : > { %v855_v30 = vmul.f32 0.5, %v854_v29 }
 0x126   : > { %v856_v31 = vsub.f32 1.5, %v855_v30 }
 0x127   : > { %v1874_v32 = vpop.eup %1873 }
 0x128   : > { %v857_v33 = vmul.f32 %v1872_v26, %v856_v31  ;;  %v863_v34 = vmul.f32 %v1874_v32, %v851_v27  ;;  %vm869_vm5 = vweird.f32 %v1874_v32 }
 0x129   : > { %vm870_vm7 = vmor %vm868_vm6, %vm869_vm5 }
 0x12a   : > { %v861_v36 = vsel %vm860_vm4, %v1872_v26, %v857_v33  ;;  %v864_v37 = vmul.f32 %v1874_v32, %v863_v34 }
 0x12b   : > { %v872_v39 = vmul.f32 %v861_v36, %v838_v13 }
 0x12c   : > { %v865_v40 = vmul.f32 0.5, %v864_v37 }
 0x12d   : > { %v877_v41 = vmul.f32 %v1867_v35, %v872_v39 }
 0x12e   : > { %v866_v42 = vsub.f32 1.5, %v865_v40 }
 0x12f   : > { %v882_v43 = vadd.f32 %v1868_v38, %v877_v41 }
 0x130   : > { %v867_v44 = vmul.f32 %v1874_v32, %v866_v42 }
 0x131   : > { %884 = vst.msk [vmem:[#allocation2] sm:$0xff] %vm822_vm0, %v882_v43 }
 0x132   : > { %v871_v45 = vsel %vm870_vm7, %v1874_v32, %v867_v44 }
 0x133   : > { %v873_v46 = vmul.f32 %v871_v45, %v839_v18 }
 0x135   : > { %v878_v47 = vmul.f32 %v1867_v35, %v873_v46 }
 0x137   : > { %v883_v48 = vadd.f32 %v1868_v38, %v878_v47 }
 0x139   : > { %885 = vst.msk [vmem:[#allocation2 + $0x8] sm:$0xff] %vm822_vm0, %v883_v48 }
 0x13a PF: > { %v1829_v49 = vld [vmem:[%s2110_s30 + $0x8] sm:$0xff]  ;;  %v1828_v50 = vld [vmem:[%s2110_s30] sm:$0xff]  ;;  %vm910_vm8 = vcmask 261120   ;;  %s2387_s18 = scalar_lea.vmem %s2348_s7, %s2100_s26  ;;  %s1970_s30 = smov 80   ;;  %vm935_vm9 = vcmask 130048   ;;  %vm1035_vm10 = vcmask 64512  }
 0x13b   : > { %v2177_v51 = vld [vmem:[#allocation2] sm:$0xff]  ;;  %920 = vmatpush.bf16.msra.mxu0 %v1829_v49  ;;  %s1971_s24 = smov 96   ;;  %s1972_s29 = smov 112   ;;  %vm1089_vm11 = vcmask 1043456   ;;  %vm1375_vm3 = vcmask 523264  }
 0x13c   : > { %v1880_v54 = vld [vmem:[%s2387_s18] ss:$0 sm:$0xff]  ;;  %s2388_s28 = sld [smem:[#allocation8_spill]]  ;;  %s1973_s27 = smov 48  }
 0x13d   : > { %s1974_s4 = smov 64   ;;  %s1975_s5 = smov 16  }
 0x13e   : > { %s2391_s21 = scalar_lea.vmem %s2352_s11, %s2100_s26  ;;  %p1810_p5 = scmp.ne.s32.totalorder %s2094_s25, 1 }
 0x13f   : > { %921 = vmatpush.bf16.msra.mxu0 %v1828_v50 }
 0x140   : > { %v2179_v52 = vld [vmem:[#allocation2 + $0x8] sm:$0xff] }
 0x141   : > { %v889_v53 = vpack.c.bf16 %v2179_v52, %v2177_v51 }
 0x142   : > { %v888_v12 = vld [vmem:[%s2388_s28] sm:$0x3] }
 0x143   : > { %1766 = vmatmul.msk.bf16.vlgmr.msra.gmra.mxu0 %vm910_vm8, %v889_v53  ;;  %v956_v13 = vperm.slane %v888_v12, 0  ;;  %v1008_v19 = vperm.slane %v888_v12, 1 }
 0x1c0   : > { %v923_v55 = vpop.f32.mrf.mxu0 }
 0x1c1   : > { %v924_v56 = vadd.f32 %v1880_v54, %v923_v55 }
 0x1c3   : > { %v928_v57 = vpack.c.bf16 %v924_v56, %v924_v56 }
 0x1c5   : > { %v931_v58 = vunpack.c.l.b16 %v928_v57 }
 0x1c7   : > { %v2189_v59 = vpack.c.b16 %v931_v58, %v931_v58 }
 0x1c8   : > { %v925_v60 = vpop.f32.mrf.mxu0 }
 0x1c9   : > { %v926_v61 = vadd.f32 %v1880_v54, %v925_v60  ;;  %960 = vrot.lane.b32.xlu0 %v2189_v59, %s1970_s30 }
 0x1cb   : > { %v929_v62 = vpack.c.bf16 %v926_v61, %v926_v61 }
 0x1cd   : > { %v984_v63 = vunpack.c.l.b16 %v929_v62 }
 0x1cf   : > { %v2192_v0 = vpack.c.b16 %v984_v63, %v984_v63 }
 0x1d1   : > { %986 = vrot.lane.b32.xlu2 %v2192_v0, %s1971_s24  ;;  %1012 = vrot.lane.b32.xlu1 %v2192_v0, %s1970_s30  ;;  %s2389_s30 = scalar_lea.vmem %s2350_s9, %s2100_s26 }
 0x1d2   : > { %958 = vrot.lane.b32.xlu0 %v2189_v59, %s1972_s29 }
 0x1d9   : > { %1010 = vrot.lane.b32.xlu1 %v2192_v0, %s1972_s29  ;;  %933 = vrot.lane.b32.xlu2 %v2189_v59, %s1971_s24  ;;  %s2390_s24 = scalar_lea.vmem %s2351_s10, %s2100_s26  ;;  %s2396_s26 = sld [smem:[#allocation10_spill]] (!%p1810_p5) }
 0x22b   : > { %v987_v1 = vpop.permute.xlu2 %986 }
 0x22c   : > { %v992_v2 = vsel %vm935_vm9, %v987_v1, 0 }
 0x22d   : > { %1001 = vmatpush.bf16.xpose.msra.mxu3 %v992_v2 }
 0x233   : > { %v934_v3 = vpop.permute.xlu2 %933 }
 0x234   : > { %1769 = vmatmul.msk.bf16.vlgmr.msra.gmra.mxu3 %vm935_vm9, %v929_v62  ;;  %v940_v4 = vsel %vm935_vm9, %v934_v3, 0 }
 0x235   : > { %949 = vmatpush.bf16.xpose.msra.mxu1 %v940_v4 }
 0x23b   : > { %v961_v5 = vpop.permute.xlu0 %960 }
 0x23c   : > { %1767 = vmatmul.msk.bf16.vlgmr.msra.gmra.mxu1 %vm935_vm9, %v928_v57  ;;  %v966_v6 = vsel %vm935_vm9, %v961_v5, 0 }
 0x23d   : > { %975 = vmatpush.bf16.xpose.msra.mxu2 %v966_v6 }
 0x243   : > { %v1013_v7 = vpop.permute.xlu1 %1012 }
 0x244   : > { %v959_v8 = vpop.permute.xlu0 %958  ;;  %v1018_v9 = vsel %vm935_vm9, %v1013_v7, 0 }
 0x245   : > { %1768 = vmatmul.msk.bf16.vlgmr.msra.gmra.mxu2 %vm935_vm9, %v959_v8  ;;  %1027 = vmatpush.bf16.xpose.msrb.mxu0 %v1018_v9 }
 0x24b   : > { %v1011_v10 = vpop.permute.xlu1 %1010 }
 0x24c   : > { %1770 = vmatmul.msk.bf16.vlgmr.msrb.gmra.mxu0 %vm935_vm9, %v1011_v10 }
 0x2b7   : > { %v1003_v11 = vpop.f32.mrf.mxu3 }
 0x2b8   : > { %v1007_v17 = vmul.f32 0.25, %v1003_v11 }
 0x2b9   : > { %v951_v14 = vpop.f32.mrf.mxu1 }
 0x2ba   : > { %v955_v15 = vmul.f32 0.25, %v951_v14  ;;  %v1009_v22 = vadd.f32 %v1008_v19, %v1007_v17  ;;  %v1831_v17 = vld [vmem:[%s2115_s23 + $0x8] sm:$0xff] }
 0x2bc   : > { %v957_v16 = vadd.f32 %v956_v13, %v955_v15  ;;  %v1042_v23 = vsel %vm1035_vm10, %v1009_v22, -inf }
 0x2be   : > { %v1036_v18 = vsel %vm1035_vm10, %v957_v16, -inf }
 0x2bf   : > { %v1005_v20 = vpop.f32.mrf.mxu3  ;;  %1037 = vmax.xlane.f32.xlu2 %v1036_v18 }
 0x2c1   : > { %v953_v21 = vpop.f32.mrf.mxu1 }
 0x2c7   : > { %1043 = vmax.xlane.f32.xlu2 %v1042_v23 }
 0x2c8   : > { %v977_v24 = vpop.f32.mrf.mxu2 }
 0x2c9   : > { %v981_v25 = vmul.f32 0.25, %v977_v24  ;;  %v1029_v26 = vpop.f32.mrf.mxu0 }
 0x2ca   : > { %v1033_v27 = vmul.f32 0.25, %v1029_v26  ;;  %v1830_v26 = vld [vmem:[%s2115_s23] sm:$0xff] }
 0x2cb   : > { %v982_v28 = vadd.f32 %v981_v25, %v956_v13 }
 0x2cc   : > { %v1034_v29 = vadd.f32 %v1033_v27, %v1008_v19 }
 0x2cd   : > { %v1039_v30 = vsel %vm1035_vm10, %v982_v28, -inf }
 0x2ce   : > { %1040 = vmax.xlane.f32.xlu0 %v1039_v30  ;;  %v1045_v31 = vsel %vm1035_vm10, %v1034_v29, -inf }
 0x2cf   : > { %1046 = vmax.xlane.f32.xlu1 %v1045_v31 }
 0x2d0   : > { %v979_v32 = vpop.f32.mrf.mxu2 }
 0x2d1   : > { %v1031_v33 = vpop.f32.mrf.mxu0 }
 0x2d2   : > { %v1881_v33 = vld [vmem:[%s2389_s30] ss:$0 sm:$0xff] }
 0x2df   : > { %1106 = vrot.lane.b32.xlu2 %v2189_v59, %s1973_s27 }
 0x332   : > { %v1038_v34 = vpop.xlane.xlu2 %1037 }
 0x333   : > { %v1048_v35 = vsub.f32 %v957_v16, %v1038_v34 }
 0x335   : > { %v1052_v36 = vmul.f32 1.442695, %v1048_v35 }
 0x337   : > { %1888 = vpow2.f32 %v1052_v36 }
 0x33a   : > { %v1044_v37 = vpop.xlane.xlu2 %1043 }
 0x33b   : > { %v1050_v47 = vsub.f32 %v1009_v22, %v1044_v37 }
 0x33d   : > { %v1889_v38 = vpop.eup %1888  ;;  %v1056_v49 = vmul.f32 1.442695, %v1050_v47 }
 0x33e   : > { %v1060_v39 = vsel %vm1035_vm10, %v1889_v38, 0.0 }
 0x33f   : > { %1061 = vadd.xlane.f32.xlu1 %v1060_v39 }
 0x341   : > { %v1041_v40 = vpop.xlane.xlu0 %1040 }
 0x342   : > { %v1049_v41 = vsub.f32 %v982_v28, %v1041_v40  ;;  %v1047_v42 = vpop.xlane.xlu1 %1046  ;;  %v1107_v43 = vpop.permute.xlu2 %1106 }
 0x343   : > { %v1051_v44 = vsub.f32 %v1034_v29, %v1047_v42  ;;  %v1112_v45 = vsel %vm1089_vm11, %v1107_v43, 0  ;;  %v1976_v42 = vmov 32.0  }
 0x344   : > { %v1054_v46 = vmul.f32 1.442695, %v1049_v41  ;;  %1121 = vmatpush.bf16.msrb.mxu2 %v1112_v45 }
 0x345   : > { %v1058_v48 = vmul.f32 1.442695, %v1051_v44 }
 0x346   : > { %1890 = vpow2.f32 %v1054_v46 }
 0x347   : > { %1892 = vpow2.f32 %v1058_v48 }
 0x348   : > { %1894 = vpow2.f32 %v1056_v49 }
 0x34c   : > { %v1891_v50 = vpop.eup %1890 }
 0x34d   : > { %v1893_v53 = vpop.eup %1892  ;;  %v1063_v54 = vsel %vm1035_vm10, %v1891_v50, 0.0 }
 0x34e   : > { %1064 = vadd.xlane.f32.xlu0 %v1063_v54  ;;  %v1069_v55 = vsel %vm1035_vm10, %v1893_v53, 0.0  ;;  %v1895_v56 = vpop.eup %1894 }
 0x34f   : > { %1070 = vadd.xlane.f32.xlu1 %v1069_v55  ;;  %v1066_v57 = vsel %vm1035_vm10, %v1895_v56, 0.0 }
 0x357   : > { %1067 = vadd.xlane.f32.xlu1 %v1066_v57 }
 0x362   : > { %1153 = vrot.lane.b32.xlu0 %v2192_v0, %s1973_s27 }
 0x36a   : > { %1084 = vrot.lane.b32.xlu0 %v2189_v59, %s1974_s4 }
 0x370   : > { %1132 = vrot.lane.b32.xlu1 %v2192_v0, %s1974_s4 }
 0x3b2   : > { %v1062_v58 = vpop.xlane.xlu1 %1061 }
 0x3c1   : > { %v1065_v60 = vpop.xlane.xlu0 %1064 }
 0x3c2   : > { %1896 = vrcp.f32 %v1065_v60  ;;  %v1071_v61 = vpop.xlane.xlu1 %1070  ;;  %v1833_v60 = vld [vmem:[%s2132_s6 + $0x8] sm:$0xff] }
 0x3c3   : > { %1898 = vrcp.f32 %v1071_v61  ;;  %1312 = vmatpush.bf16.msra.mxu2 %v1833_v60 }
 0x3c4   : > { %1900 = vrcp.f32 %v1062_v58 }
 0x3c8   : > { %v1897_v62 = vpop.eup %1896 }
 0x3c9   : > { %v1077_v63 = vmul.f32 %v1897_v62, %v1891_v50  ;;  %v1899_v2 = vpop.eup %1898 }
 0x3ca   : > { %v1079_v3 = vmul.f32 %v1899_v2, %v1893_v53  ;;  %v1068_v5 = vpop.xlane.xlu1 %1067  ;;  %v1901_v0 = vpop.eup %1900 }
 0x3cb   : > { %v1081_v1 = vpack.c.bf16 %v1077_v63, %v1077_v63  ;;  %1902 = vrcp.f32 %v1068_v5  ;;  %v1076_v7 = vmul.f32 %v1901_v0, %v1889_v38  ;;  %v1832_v63 = vld [vmem:[%s2132_s6] sm:$0xff] }
 0x3cc   : > { %v1083_v59 = vpack.c.bf16 %v1079_v3, %v1079_v3  ;;  %1904 = vrcp.f32 %v1976_v42  ;;  %1313 = vmatpush.bf16.msra.mxu2 %v1832_v63 }
 0x3cd   : > { %1772 = vmatmul.msk.bf16.vlgmr.msrb.gmra.mxu2 %vm1035_vm10, %v1081_v1  ;;  %v1080_v11 = vpack.c.bf16 %v1076_v7, %v1076_v7 }
 0x3d1   : > { %v1903_v10 = vpop.eup %1902 }
 0x3d2   : > { %v1078_v12 = vmul.f32 %v1903_v10, %v1895_v56  ;;  %v1905_v43 = vpop.eup %1904 }
 0x3d3   : > { %v1228_v44 = vmul.f32 32.0, %v1905_v43  ;;  %vm1232_vm12 = vweird.f32 %v1905_v43 }
 0x3d4   : > { %v1154_v4 = vpop.permute.xlu0 %1153  ;;  %v1082_v15 = vpack.c.bf16 %v1078_v12, %v1078_v12 }
 0x3d5   : > { %v1159_v6 = vsel %vm1089_vm11, %v1154_v4, 0  ;;  %v1229_v45 = vsub.f32 1.0, %v1228_v44 }
 0x3d6   : > { %1168 = vmatpush.bf16.msra.mxu0 %v1159_v6 }
 0x3d7   : > { %v1230_v46 = vmul.f32 %v1905_v43, %v1229_v45 }
 0x3d9   : > { %1774 = vmatmul.msk.bf16.vlgmr.msra.gmra.mxu0 %vm1035_vm10, %v1083_v59  ;;  %v1231_v47 = vadd.f32 %v1905_v43, %v1230_v46 }
 0x3dc   : > { %v1085_v8 = vpop.permute.xlu0 %1084 }
 0x3dd   : > { %v1091_v9 = vsel %vm1089_vm11, %v1085_v8, 0 }
 0x3de   : > { %1100 = vmatpush.bf16.msrb.mxu1 %v1091_v9 }
 0x3e1   : > { %1771 = vmatmul.msk.bf16.vlgmr.msrb.gmra.mxu1 %vm1035_vm10, %v1080_v11 }
 0x3e2   : > { %v1133_v13 = vpop.permute.xlu1 %1132  ;;  %1209 = vmatpush.bf16.msra.mxu1 %v1831_v17 }
 0x3e3   : > { %v1138_v14 = vsel %vm1089_vm11, %v1133_v13, 0 }
 0x3e4   : > { %1147 = vmatpush.bf16.msrb.mxu3 %v1138_v14 }
 0x3e6   : > { %1210 = vmatpush.bf16.msra.mxu1 %v1830_v26  ;;  %v1837_v26 = vld [vmem:[%s2142_s2 + $0x18] sm:$0xff] }
 0x3e7   : > { %1773 = vmatmul.msk.bf16.vlgmr.msrb.gmra.mxu3 %vm1035_vm10, %v1082_v15  ;;  %v1882_v15 = vld [vmem:[%s2390_s24] ss:$0 sm:$0xff]  ;;  %s2393_s24 = sld [smem:[#allocation16_spill]] (!%p1810_p5) }
 0x3e8   : > { %1383 = vmatpush.bf16.msra.mxu3 %v1837_v26  ;;  %v1887_v26 = vld [vmem:[%s812_s19] ss:$0 sm:$0xff] }
 0x450   : > { %v1123_v16 = vpop.f32.mrf.mxu2 }
 0x456   : > { %v1170_v18 = vpop.f32.mrf.mxu0 }
 0x457   : > { %v1875_v19 = vpack.i.bf16 %v1170_v18, %v1123_v16 }
 0x458   : > { %v1125_v20 = vpop.f32.mrf.mxu2 }
 0x459   : > { %1876 = vrot.lane.b32.xlu2 %v1875_v19, %s1975_s5  ;;  %v1883_v19 = vld [vmem:[%s2391_s21] ss:$0 sm:$0xff]  ;;  %s2394_s21 = sld [smem:[#allocation9_spill]] (!%p1810_p5) }
 0x45e   : > { %v1102_v21 = vpop.f32.mrf.mxu1  ;;  %v1172_v22 = vpop.f32.mrf.mxu0 }
 0x466   : > { %v1104_v23 = vpop.f32.mrf.mxu1 }
 0x46a   : > { %v1149_v24 = vpop.f32.mrf.mxu3 }
 0x472   : > { %v1151_v25 = vpop.f32.mrf.mxu3 }
 0x4b3   : > { %v1877_v27 = vpop.permute.xlu2 %1876 }
 0x4b4   : > { %v1879_v28 = vunpack.i.h.bf16 %v1877_v27  ;;  %v1878_v29 = vunpack.i.l.bf16 %v1877_v27  ;;  %v1836_v27 = vld [vmem:[%s2142_s2 + $0x10] sm:$0xff] }
 0x4b5   : > { %1384 = vmatpush.bf16.msra.mxu3 %v1836_v27 }
 0x4b6   : > { %v1178_v30 = vsel %vm935_vm9, %v1149_v24, %v1879_v28  ;;  %v1131_v31 = vsel %vm935_vm9, %v1102_v21, %v1878_v29  ;;  %v1835_v28 = vld [vmem:[%s2142_s2 + $0x8] sm:$0xff]  ;;  %v1884_v29 = vld [vmem:[%s798_s8] ss:$0 sm:$0xff]  ;;  %s2395_s8 = sld [smem:[#allocation17_spill]] (!%p1810_p5) }
 0x4b7   : > { %v1179_v32 = vpack.c.bf16 %v1178_v30, %v1131_v31  ;;  %v1834_v30 = vld [vmem:[%s2142_s2] sm:$0xff] }
 0x4b9   : > { %1783 = vmatmul.msk.bf16.vlgmr.msra.gmra.mxu1 %vm910_vm8, %v1179_v32  ;;  %1385 = vmatpush.bf16.msra.mxu3 %v1835_v28 }
 0x4bd   : > { %1386 = vmatpush.bf16.msra.mxu3 %v1834_v30 }
 0x536   : > { %v1212_v34 = vpop.f32.mrf.mxu1 }
 0x537   : > { %v1213_v35 = vadd.f32 %v1881_v33, %v1212_v34 }
 0x539   : > { %v1217_v36 = vadd.f32 %v1213_v35, %v2177_v51  ;;  %v2246_v51 = vsel %vm1232_vm12, %v1905_v43, %v1231_v47 }
 0x53b   : > { %v1221_v37 = vsel %vm910_vm8, %v1217_v36, 0.0 }
 0x53c   : > { %1222 = vadd.xlane.f32.xlu0 %v1221_v37 }
 0x53e   : > { %v1214_v38 = vpop.f32.mrf.mxu1 }
 0x53f   : > { %v1215_v39 = vadd.f32 %v1881_v33, %v1214_v38 }
 0x541   : > { %v1218_v40 = vadd.f32 %v1215_v39, %v2179_v52 }
 0x543   : > { %v1224_v41 = vsel %vm910_vm8, %v1218_v40, 0.0 }
 0x544   : > { %1225 = vadd.xlane.f32.xlu2 %v1224_v41 }
 0x5af   : > { %v1223_v48 = vpop.xlane.xlu0 %1222 }
 0x5b0   : > { %v1234_v49 = vmul.f32 %v2246_v51, %v1223_v48 }
 0x5b2   : > { %v1236_v50 = vsub.f32 %v1217_v36, %v1234_v49 }
 0x5b4   : > { %v1238_v52 = vmul.f32 %v1236_v50, %v1236_v50 }
 0x5b6   : > { %v1240_v53 = vsel %vm910_vm8, %v1238_v52, 0.0 }
 0x5b7   : > { %v1226_v54 = vpop.xlane.xlu2 %1225  ;;  %1241 = vadd.xlane.f32.xlu1 %v1240_v53 }
 0x5b8   : > { %v1235_v55 = vmul.f32 %v2246_v51, %v1226_v54 }
 0x5ba   : > { %v1237_v56 = vsub.f32 %v1218_v40, %v1235_v55  ;;  %v1885_v55 = vld [vmem:[%s806_s3] ss:$0 sm:$0xff] }
 0x5bc   : > { %v1239_v57 = vmul.f32 %v1237_v56, %v1237_v56 }
 0x5be   : > { %v1243_v58 = vsel %vm910_vm8, %v1239_v57, 0.0 }
 0x5bf   : > { %1244 = vadd.xlane.f32.xlu0 %v1243_v58 }
 0x62a   : > { %v1242_v61 = vpop.xlane.xlu1 %1241 }
 0x62b   : > { %v1246_v62 = vmul.f32 %v1242_v61, %v2246_v51 }
 0x62d   : > { %v1248_v1 = vadd.f32 1e-07, %v1246_v62 }
 0x62f   : > { %1906 = vrsqrt.f32 %v1248_v1  ;;  %vm1256_vm14 = vweird.f32 %v1248_v1 }
 0x632   : > { %v1245_v2 = vpop.xlane.xlu0 %1244 }
 0x633   : > { %v1247_v3 = vmul.f32 %v1245_v2, %v2246_v51 }
 0x635   : > { %v1907_v4 = vpop.eup %1906  ;;  %v1249_v5 = vadd.f32 1e-07, %v1247_v3 }
 0x636   : > { %v1251_v6 = vmul.f32 %v1907_v4, %v1248_v1  ;;  %vm1257_vm13 = vweird.f32 %v1907_v4 }
 0x637   : > { %1908 = vrsqrt.f32 %v1249_v5  ;;  %vm1258_vm15 = vmor %vm1256_vm14, %vm1257_vm13  ;;  %vm1266_vm1 = vweird.f32 %v1249_v5 }
 0x638   : > { %v1252_v59 = vmul.f32 %v1907_v4, %v1251_v6 }
 0x63a   : > { %v1253_v0 = vmul.f32 0.5, %v1252_v59 }
 0x63c   : > { %v1254_v7 = vsub.f32 1.5, %v1253_v0 }
 0x63d   : > { %v1909_v8 = vpop.eup %1908 }
 0x63e   : > { %v1255_v9 = vmul.f32 %v1907_v4, %v1254_v7  ;;  %v1261_v10 = vmul.f32 %v1909_v8, %v1249_v5  ;;  %vm1267_vm0 = vweird.f32 %v1909_v8 }
 0x63f   : > { %vm1268_vm2 = vmor %vm1266_vm1, %vm1267_vm0 }
 0x640   : > { %v1262_v11 = vmul.f32 %v1909_v8, %v1261_v10  ;;  %v1259_v12 = vsel %vm1258_vm15, %v1907_v4, %v1255_v9 }
 0x641   : > { %v1270_v16 = vmul.f32 %v1259_v12, %v1236_v50 }
 0x642   : > { %v1263_v13 = vmul.f32 0.5, %v1262_v11 }
 0x643   : > { %v1275_v20 = vmul.f32 %v1882_v15, %v1270_v16 }
 0x644   : > { %v1264_v14 = vsub.f32 1.5, %v1263_v13 }
 0x645   : > { %v1280_v23 = vadd.f32 %v1883_v19, %v1275_v20 }
 0x646   : > { %v1265_v17 = vmul.f32 %v1909_v8, %v1264_v14 }
 0x648   : > { %v1269_v18 = vsel %vm1268_vm2, %v1909_v8, %v1265_v17 }
 0x649   : > { %v1271_v21 = vmul.f32 %v1269_v18, %v1237_v56 }
 0x64b   : > { %v1276_v22 = vmul.f32 %v1882_v15, %v1271_v21 }
 0x64d   : > { %v1281_v24 = vadd.f32 %v1883_v19, %v1276_v22 }
 0x64f   : > { %v1282_v25 = vpack.c.bf16 %v1281_v24, %v1280_v23 }
 0x651   : > { %1792 = vmatmul.msk.bf16.vlgmr.msra.gmra.mxu2 %vm910_vm8, %v1282_v25 }
 0x6d4   : > { %v1315_v31 = vpop.f32.mrf.mxu2 }
 0x6d5   : > { %v1316_v32 = vadd.f32 %v1884_v29, %v1315_v31 }
 0x6d7   : > { %v1320_v33 = vmul.f32 %v1316_v32, %v1316_v32 }
 0x6d9   : > { %v1322_v34 = vmul.f32 %v1320_v33, %v1316_v32 }
 0x6db   : > { %v1324_v35 = vmul.f32 0.044715, %v1322_v34 }
 0x6dc   : > { %v1317_v36 = vpop.f32.mrf.mxu2 }
 0x6dd   : > { %v1326_v37 = vadd.f32 %v1324_v35, %v1316_v32  ;;  %v1318_v38 = vadd.f32 %v1884_v29, %v1317_v36 }
 0x6df   : > { %v1328_v39 = vmul.f32 0.7978846, %v1326_v37  ;;  %v1321_v40 = vmul.f32 %v1318_v38, %v1318_v38 }
 0x6e1   : > { %v1323_v41 = vmul.f32 %v1321_v40, %v1318_v38  ;;  %1910 = vtanh.f32 %v1328_v39 }
 0x6e3   : > { %v1325_v42 = vmul.f32 0.044715, %v1323_v41 }
 0x6e5   : > { %v1327_v43 = vadd.f32 %v1325_v42, %v1318_v38 }
 0x6e7   : > { %v1329_v44 = vmul.f32 0.7978846, %v1327_v43  ;;  %v1911_v45 = vpop.eup %1910 }
 0x6e8   : > { %v1332_v46 = vadd.f32 1.0, %v1911_v45 }
 0x6e9   : > { %1912 = vtanh.f32 %v1329_v44 }
 0x6ea   : > { %v1334_v48 = vmul.f32 0.5, %v1332_v46 }
 0x6ec   : > { %v1336_v52 = vmul.f32 %v1334_v48, %v1316_v32 }
 0x6ef   : > { %v1913_v47 = vpop.eup %1912 }
 0x6f0   : > { %v1333_v49 = vadd.f32 1.0, %v1913_v47 }
 0x6f2   : > { %v1335_v50 = vmul.f32 0.5, %v1333_v49 }
 0x6f4   : > { %v1337_v53 = vmul.f32 %v1335_v50, %v1318_v38 }
 0x6f6   : > { %v1338_v54 = vpack.c.bf16 %v1337_v53, %v1336_v52 }
 0x6f8   : > { %1809 = vmatmul.msk.bf16.vlgmr.msra.gmra.mxu3 %vm1375_vm3, %v1338_v54 }
 0x77b   : > { %v1388_v56 = vpop.f32.mrf.mxu3 }
 0x77c   : > { %v1389_v57 = vadd.f32 %v1885_v55, %v1388_v56 }
 0x77e   : > { %v1393_v58 = vadd.f32 %v1389_v57, %v1280_v23 }
 0x780   : > { %v1397_v60 = vsel %vm910_vm8, %v1393_v58, 0.0 }
 0x781   : > { %1398 = vadd.xlane.f32.xlu2 %v1397_v60 }
 0x783   : > { %v1390_v61 = vpop.f32.mrf.mxu3 }
 0x784   : > { %v1391_v62 = vadd.f32 %v1885_v55, %v1390_v61 }
 0x786   : > { %v1394_v63 = vadd.f32 %v1391_v62, %v1281_v24  ;;  %v1886_v24 = vld [vmem:[%s809_s0] ss:$0 sm:$0xff]  ;;  %s2392_s0 = sld [smem:[#allocation15_spill]] (!%p1810_p5) }
 0x788   : > { %v1400_v1 = vsel %vm910_vm8, %v1394_v63, 0.0 }
 0x789   : > { %1401 = vadd.xlane.f32.xlu0 %v1400_v1 }
 0x7f4   : > { %v1399_v2 = vpop.xlane.xlu2 %1398 }
 0x7f5   : > { %v1403_v3 = vmul.f32 %v1399_v2, %v2246_v51 }
 0x7f7   : > { %v1405_v4 = vsub.f32 %v1393_v58, %v1403_v3 }
 0x7f9   : > { %v1407_v5 = vmul.f32 %v1405_v4, %v1405_v4 }
 0x7fb   : > { %v1409_v6 = vsel %vm910_vm8, %v1407_v5, 0.0 }
 0x7fc   : > { %v1402_v59 = vpop.xlane.xlu0 %1401  ;;  %1410 = vadd.xlane.f32.xlu2 %v1409_v6 }
 0x7fd   : > { %v1404_v0 = vmul.f32 %v1402_v59, %v2246_v51 }
 0x7ff   : > { %v1406_v7 = vsub.f32 %v1394_v63, %v1404_v0 }
 0x801   : > { %v1408_v8 = vmul.f32 %v1406_v7, %v1406_v7 }
 0x803   : > { %v1412_v9 = vsel %vm910_vm8, %v1408_v8, 0.0 }
 0x804   : > { %1413 = vadd.xlane.f32.xlu1 %v1412_v9 }
 0x86f   : > { %v1411_v10 = vpop.xlane.xlu2 %1410 }
 0x870   : > { %v1415_v11 = vmul.f32 %v1411_v10, %v2246_v51 }
 0x872   : > { %v1417_v12 = vadd.f32 1e-07, %v1415_v11 }
 0x874   : > { %1914 = vrsqrt.f32 %v1417_v12  ;;  %vm1425_vm5 = vweird.f32 %v1417_v12 }
 0x877   : > { %v1414_v13 = vpop.xlane.xlu1 %1413 }
 0x878   : > { %v1416_v14 = vmul.f32 %v1414_v13, %v2246_v51 }
 0x87a   : > { %v1915_v15 = vpop.eup %1914  ;;  %v1418_v16 = vadd.f32 1e-07, %v1416_v14 }
 0x87b   : > { %v1420_v17 = vmul.f32 %v1915_v15, %v1417_v12  ;;  %vm1426_vm4 = vweird.f32 %v1915_v15 }
 0x87c   : > { %1916 = vrsqrt.f32 %v1418_v16  ;;  %vm1427_vm6 = vmor %vm1425_vm5, %vm1426_vm4  ;;  %vm1435_vm9 = vweird.f32 %v1418_v16 }
 0x87d   : > { %v1421_v18 = vmul.f32 %v1915_v15, %v1420_v17 }
 0x87f   : > { %v1422_v19 = vmul.f32 0.5, %v1421_v18 }
 0x881   : > { %v1423_v20 = vsub.f32 1.5, %v1422_v19 }
 0x882   : > { %v1917_v21 = vpop.eup %1916 }
 0x883   : > { %v1424_v22 = vmul.f32 %v1915_v15, %v1423_v20  ;;  %v1430_v23 = vmul.f32 %v1917_v21, %v1418_v16  ;;  %vm1436_vm7 = vweird.f32 %v1917_v21 }
 0x884   : > { %vm1437_vm10 = vmor %vm1435_vm9, %vm1436_vm7 }
 0x885   : > { %v1428_v51 = vsel %vm1427_vm6, %v1915_v15, %v1424_v22  ;;  %v1431_v25 = vmul.f32 %v1917_v21, %v1430_v23 }
 0x886   : > { %v1439_v27 = vmul.f32 %v1428_v51, %v1405_v4 }
 0x887   : > { %v1432_v28 = vmul.f32 0.5, %v1431_v25 }
 0x888   : > { %v1444_v29 = vmul.f32 %v1886_v24, %v1439_v27 }
 0x889   : > { %v1433_v30 = vsub.f32 1.5, %v1432_v28 }
 0x88a   : > { %v1449_v31 = vadd.f32 %v1887_v26, %v1444_v29 }
 0x88b   : > { %v1434_v32 = vmul.f32 %v1917_v21, %v1433_v30 }
 0x88c   : > { %1451 = vst.msk [vmem:[#allocation2] sm:$0xff] %vm910_vm8, %v1449_v31 }
 0x88d   : > { %v1438_v33 = vsel %vm1437_vm10, %v1917_v21, %v1434_v32 }
 0x88e   : > { %v1440_v34 = vmul.f32 %v1438_v33, %v1406_v7 }
 0x890   : > { %v1445_v35 = vmul.f32 %v1886_v24, %v1440_v34  ;;  %1456 = sbr.rel (%p1810_p5) target bundleno = 2805 (0xaf5), region = 108 }
 0x892   : > { %v1450_v36 = vadd.f32 %v1887_v26, %v1445_v35 }
 0x894   : > { %1452 = vst.msk [vmem:[#allocation2 + $0x8] sm:$0xff] %vm910_vm8, %v1450_v36 }
 0x895   : > { %v1839_v37 = vld [vmem:[%s2392_s0 + $0x8] sm:$0xff]  ;;  %v1838_v38 = vld [vmem:[%s2392_s0] sm:$0xff]  ;;  %v1457_v39 = vpack.c.bf16 %v1450_v36, %v1449_v31  ;;  %v1497_v40 = vlaneseq  ;;  %vm1581_vm0 = vcmask 0  }
 0x896   : > { %1487 = vmatpush.bf16.msra.mxu0 %v1839_v37  ;;  %v1918_v42 = vld [vmem:[%s2393_s24] ss:$0 sm:$0xff]  ;;  %v1525_v49 = vld [vmem:[%s2394_s21 + $0x8] sm:$0xff] }
 0x897   : > { %v1498_v41 = vand.u32 127, %v1497_v40  ;;  %v1524_v44 = vld [vmem:[%s2394_s21] sm:$0xff]  ;;  %v1535_v1 = vld [vmem:[%s2396_s26 + $0x8] sm:$0xff] }
 0x898   : > { %v1534_v63 = vld [vmem:[%s2396_s26] sm:$0xff] }
 0x899   : > { %vm1499_vm11 = vcmp.lt.s32.totalorder %v1498_v41, 5 }
 0x89a   : > { %1488 = vmatpush.bf16.msra.mxu0 %v1838_v38 }
 0x89d   : > { %1819 = vmatmul.msk.bf16.vlgmr.msra.gmra.mxu0 %vm910_vm8, %v1457_v39  ;;  %vm1538_vm8 = vcmask 7168  }
 0x89e   : > { %v1552_v2 = vsel %vm1538_vm8, %v1534_v63, 0.0  ;;  %v1553_v3 = vsel %vm1538_vm8, %v1535_v1, 0.0 }
 0x89f   : > { %v1554_v4 = vadd.f32 %v1553_v3, %v1552_v2 }
 0x91a   : > { %v1490_v43 = vpop.f32.mrf.mxu0 }
 0x91b   : > { %v1491_v45 = vadd.f32 %v1918_v42, %v1490_v43 }
 0x91d   : > { %1495 = vst [vmem:[%s2395_s8] sm:$0xff] %v1491_v45  ;;  %v1502_v46 = vsel %vm1499_vm11, %v1491_v45, -1e+30  ;;  %v1526_v47 = vmul.f32 %v1524_v44, %v1491_v45 }
 0x91e   : > { %1504 = vmax.xlane.f32.xlu0 %v1502_v46 }
 0x91f   : > { %1528 = vadd.xlane.f32.xlu2 %v1526_v47 }
 0x922   : > { %v1492_v48 = vpop.f32.mrf.mxu0 }
 0x923   : > { %v1493_v50 = vadd.f32 %v1918_v42, %v1492_v48 }
 0x925   : > { %1496 = vst [vmem:[%s2395_s8 + $0x8] sm:$0xff] %v1493_v50  ;;  %v1503_v52 = vsel %vm1499_vm11, %v1493_v50, -1e+30  ;;  %v1527_v53 = vmul.f32 %v1525_v49, %v1493_v50 }
 0x926   : > { %1506 = vmax.xlane.f32.xlu0 %v1503_v52 }
 0x927   : > { %1530 = vadd.xlane.f32.xlu2 %v1527_v53 }
 0x991   : > { %v1505_v54 = vpop.xlane.xlu0 %1504 }
 0x992   : > { %v1508_v55 = vsub.f32 %v1502_v46, %v1505_v54  ;;  %v1529_v7 = vpop.xlane.xlu2 %1528 }
 0x994   : > { %v1510_v56 = vmul.f32 1.442695, %v1508_v55 }
 0x996   : > { %1919 = vpow2.f32 %v1510_v56 }
 0x999   : > { %v1507_v57 = vpop.xlane.xlu0 %1506 }
 0x99a   : > { %v1509_v58 = vsub.f32 %v1503_v52, %v1507_v57  ;;  %v1531_v13 = vpop.xlane.xlu2 %1530 }
 0x99c   : > { %v1920_v60 = vpop.eup %1919  ;;  %v1512_v61 = vmul.f32 1.442695, %v1509_v58 }
 0x99d   : > { %1514 = vadd.xlane.f32.xlu1 %v1920_v60 }
 0x99e   : > { %1921 = vpow2.f32 %v1512_v61 }
 0x9a4   : > { %v1922_v62 = vpop.eup %1921 }
 0x9a5   : > { %1516 = vadd.xlane.f32.xlu1 %v1922_v62 }
 0x9ad   : > { %1555 = vadd.xlane.f32.xlu1 %v1554_v4 }
 0xa10   : > { %v1515_v5 = vpop.xlane.xlu1 %1514 }
 0xa11   : > { %1923 = vlog2.f32 %v1515_v5 }
 0xa17   : > { %v1924_v6 = vpop.eup %1923 }
 0xa18   : > { %v1519_v59 = vmul.f32 0.6931472, %v1924_v6  ;;  %v1517_v0 = vpop.xlane.xlu1 %1516 }
 0xa19   : > { %1925 = vlog2.f32 %v1517_v0 }
 0xa1a   : > { %v1522_v8 = vadd.f32 %v1519_v59, %v1505_v54 }
 0xa1c   : > { %v1532_v10 = vsub.f32 %v1522_v8, %v1529_v7 }
 0xa1e   : > { %v1536_v15 = vmul.f32 %v1534_v63, %v1532_v10 }
 0xa1f   : > { %v1926_v9 = vpop.eup %1925 }
 0xa20   : > { %v1521_v11 = vmul.f32 0.6931472, %v1926_v9  ;;  %v1539_v17 = vsel %vm1538_vm8, %v1536_v15, 0.0  ;;  %v1556_v20 = vpop.xlane.xlu1 %1555 }
 0xa21   : > { %v1557_v21 = vrot.slane %v1556_v20, 4 }
 0xa22   : > { %v1523_v12 = vadd.f32 %v1521_v11, %v1507_v57 }
 0xa23   : > { %v1558_v22 = vadd.f32 %v1557_v21, %v1556_v20 }
 0xa24   : > { %v1533_v14 = vsub.f32 %v1523_v12, %v1531_v13 }
 0xa25   : > { %v1559_v23 = vrot.slane %v1558_v22, 2 }
 0xa26   : > { %v1537_v16 = vmul.f32 %v1535_v1, %v1533_v14 }
 0xa27   : > { %v1560_v26 = vadd.f32 %v1559_v23, %v1558_v22 }
 0xa28   : > { %v1540_v18 = vsel %vm1538_vm8, %v1537_v16, 0.0 }
 0xa29   : > { %v1541_v19 = vadd.f32 %v1540_v18, %v1539_v17  ;;  %v1561_v29 = vrot.slane %v1560_v26, 1 }
 0xa2b   : > { %1542 = vadd.xlane.f32.xlu0 %v1541_v19  ;;  %v1562_v32 = vadd.f32 %v1561_v29, %v1560_v26 }
 0xa9e   : > { %v1543_v24 = vpop.xlane.xlu0 %1542 }
 0xa9f   : > { %v1544_v51 = vrot.slane %v1543_v24, 4 }
 0xaa1   : > { %v1545_v25 = vadd.f32 %v1544_v51, %v1543_v24 }
 0xaa3   : > { %v1546_v27 = vrot.slane %v1545_v25, 2 }
 0xaa5   : > { %v1547_v28 = vadd.f32 %v1546_v27, %v1545_v25 }
 0xaa7   : > { %v1548_v30 = vrot.slane %v1547_v28, 1 }
 0xaa9   : > { %v1549_v31 = vadd.f32 %v1548_v30, %v1547_v28 }
 0xaab   : > { %1840 = vpush %v1549_v31 }
 0xaac   : > { %1842 = vpush %v1562_v32 }
 0xadc   : > { %s1841_s6 = spop %1840 }
 0xadd   : > { %s1843_s23 = spop %1842  ;;  %v1551_v44 = vstv %s1841_s6 }
 0xade   : > { %v1564_v33 = vstv %s1843_s23 }
 0xadf   : > { %v1565_v34 = vmax.f32 %v1564_v33, 1.0 }
 0xae1   : > { %1927 = vrcp.f32 %v1565_v34  ;;  %v1577_v38 = vand.u32 2147483648, %v1565_v34  ;;  %v1575_v40 = vand.u32 2147483647, %v1565_v34  ;;  %vm1571_vm13 = vweird.f32 %v1565_v34 }
 0xae3   : > { %v1578_v42 = vor.u32 1.1754944e-38, %v1577_v38  ;;  %vm1576_vm15 = vcmp.eq.f32.partialorder %v1575_v40, 8.507059e+37 }
 0xae7   : > { %v1928_v35 = vpop.eup %1927 }
 0xae8   : > { %v1567_v36 = vmul.f32 %v1928_v35, %v1565_v34  ;;  %vm1572_vm12 = vweird.f32 %v1928_v35 }
 0xae9   : > { %vm1573_vm14 = vmor %vm1571_vm13, %vm1572_vm12 }
 0xaea   : > { %v1568_v37 = vsub.f32 1.0, %v1567_v36 }
 0xaec   : > { %v1569_v39 = vmul.f32 %v1928_v35, %v1568_v37 }
 0xaee   : > { %v1570_v41 = vadd.f32 %v1928_v35, %v1569_v39 }
 0xaf0   : > { %v1574_v43 = vsel %vm1573_vm14, %v1928_v35, %v1570_v41 }
 0xaf1   : > { %v1579_v45 = vsel %vm1576_vm15, %v1578_v42, %v1574_v43 }
 0xaf2   : > { %v1580_v46 = vmul.f32 %v1579_v45, %v1551_v44 }
 0xaf4   : > { %1582 = vst.msk [vmem:[#allocation3] sm:$0x1] %vm1581_vm0, %v1580_v46 }
 0xaf5 PF: > { %p1848_p6 = scmp.eq.s32.totalorder %s2094_s25, 1  ;;  %s1977_s24 = smov [#allocation3]  }
 0xaf6   : > { %s1592_s29 = sshll.u32 %s1977_s24, 4  ;;  %s2397_s27 = sld [smem:[#allocation18_spill]]  ;;  %s1593_s29 = int_to_ptr.vmem [resolvable:$true] %s1592_s29 }
 0xafc   : > { %s1594_s2 = sshll.u32 %s2397_s27, 4  ;;  %s1595_s2 = int_to_ptr.hbm [resolvable:$true] %s1594_s2 }
 0xafd   : > { %1845 = dma.vmem_to_hbm [thread:$0]  (%p1848_p6), %s1593_s29, 16, %s1595_s2, [#allocation4]  }
 0xafe   : > { %1962 = dma.done.wait (%p1848_p6), [#allocation4], 16  }
 0xaff   : > { %1964 = vsyncadd (%p1848_p6), [#allocation4], 4294967280 }
 0xb00 PF: > { %s2398_s3 = sld [smem:[#allocation6_spill]] }
 0xb06   : > { %s33_s2 = sadd.s32 1, %s2398_s3  }
 0xb07   : > { %p30_p7 = scmp.ge.s32.totalorder %s33_s2, 4  }
 0xb09   :  { %32 = sbr.rel (!%p30_p7) target bundleno = 14 (0xe), region = 176 }
 0xb0e   :  { %1611 = vsyncpa [#allocation4], 1 }
 0xb0f   :  { %1613 = vsyncpa [#allocation4 + $0x1], 1 }

</bundles_post_ra>
